<compile_context>
chip_gen: v5e
topology: v5e:2x2
jax: 0.10.0
libtpu: 0.0.40
codegen_flags: <defaults>
</compile_context>

<pallas_src>
import math

import jax
import jax.numpy as jnp
from jax import lax
from jax.experimental import pallas as pl
from jax.experimental.pallas import tpu as pltpu

# Small, module-consistent problem sizes.
BATCH = 2
SEQ = 8          # K
EMB = 32         # emp_dim (divisible by NUM_HEADS)
FF = 64          # feedforward_dim
NUM_HEADS = 4
HEAD_DIM = EMB // NUM_HEADS
EPS = 1e-5       # nn.LayerNorm default eps
SCALE = 1.0 / math.sqrt(HEAD_DIM)

# ---------------------------------------------------------------------------
# Packed-parameter slab layout.
# Weight slab W: (EMB, 768) -- every matrix has EMB rows and starts at a
# multiple-of-128 column (no lane rotates before the MXU).
# ---------------------------------------------------------------------------
W_SA_QKV = slice(0, 3 * EMB)             # self-attn  Wq^T|Wk^T|Wv^T (E, 3E), scale folded in Wq
W_SA_WO  = slice(128, 128 + EMB)         # self-attn  Wo^T           (E, E)
W_CA_Q   = slice(256, 256 + EMB)         # cross-attn Wq^T           (E, E), scale folded in
W_CA_KV  = slice(384, 384 + 2 * EMB)     # cross-attn Wk^T|Wv^T      (E, 2E)
W_CA_WO  = slice(512, 512 + EMB)         # cross-attn Wo^T           (E, E)
W_FF1    = slice(640, 640 + FF)          # FFN W1^T                  (E, F)
W_COLS = 768

# Bias / LayerNorm slab B: (16, 128) -- one parameter vector per sublane row, lane 0 start.
ROW_SA_QKV_B = 0   # width 3*EMB (bq scaled)
ROW_SA_O_B   = 1   # width EMB
ROW_CA_Q_B   = 2   # width EMB (scaled)
ROW_CA_KV_B  = 3   # width 2*EMB
ROW_CA_O_B   = 4   # width EMB
ROW_N1G, ROW_N1B = 5, 6
ROW_N2G, ROW_N2B = 7, 8
ROW_N3G, ROW_N3B = 9, 10
ROW_FF1_B = 11     # width FF
ROW_FF2_B = 12     # width EMB
B_ROWS = 16


# ---------------------------------------------------------------------------
# In-kernel math helpers.
# ---------------------------------------------------------------------------
def _layer_norm(x, g, b):
    mu = jnp.mean(x, axis=-1, keepdims=True)
    var = jnp.mean((x - mu) ** 2, axis=-1, keepdims=True)
    return (x - mu) * lax.rsqrt(var + EPS) * g + b


def _mha(q, k, v, wo_t, bo, mask):
    """Multi-head attention on already-projected q/k/v of shape (N*K, E).

    The 1/sqrt(dh) scale is already folded into Wq/bq at pack time.
    Only leading/sublane reshapes and 8-lane static slices are used; the per-head
    output projections accumulate (no concatenates, no cross-lane repacking).
    """
    q3 = q.reshape(BATCH, SEQ, EMB)
    k3 = k.reshape(BATCH, SEQ, EMB)
    v3 = v.reshape(BATCH, SEQ, EMB)
    acc = None
    for h in range(NUM_HEADS):
        sl = slice(h * HEAD_DIM, (h + 1) * HEAD_DIM)
        s = jnp.einsum('nqd,nkd->nqk', q3[:, :, sl], k3[:, :, sl],
                       preferred_element_type=jnp.float32)            # (N, K, K)
        if mask is not None:
            s = s + mask[None, :, :]
        s = s - jnp.max(s, axis=-1, keepdims=True)
        p = jnp.exp(s)
        p = p * pl.reciprocal(jnp.sum(p, axis=-1, keepdims=True), approx=True)
        ctx = jnp.einsum('nqk,nkd->nqd', p, v3[:, :, sl],
                         preferred_element_type=jnp.float32)          # (N, K, dh)
        contrib = jnp.dot(ctx.reshape(BATCH * SEQ, HEAD_DIM), wo_t[sl, :],
                          preferred_element_type=jnp.float32)         # (N*K, E)
        acc = contrib if acc is None else acc + contrib
    return acc + bo


# ---------------------------------------------------------------------------
# Pallas kernel: the full decoder block for the whole batch in one invocation.
# ---------------------------------------------------------------------------
def decoder_block_kernel(dec_ref, enc_ref, mask_ref, w_ref, b_ref, w2t_ref, out_ref):
    dec = dec_ref[...]                      # (N*K, E)
    enc = enc_ref[...]                      # (N*K, E)
    mask = mask_ref[...]                    # (K, K)

    def brow(r, w):                         # aligned bias / gamma / beta fetch, (1, w)
        return b_ref[r:r + 1, 0:w]

    # masked self-attention -> (dropout = identity) -> norm1(residual)
    qkv = jnp.dot(dec, w_ref[:, W_SA_QKV],
                  preferred_element_type=jnp.float32) + brow(ROW_SA_QKV_B, 3 * EMB)
    out1 = _mha(qkv[:, 0:EMB], qkv[:, EMB:2 * EMB], qkv[:, 2 * EMB:3 * EMB],
                w_ref[:, W_SA_WO], brow(ROW_SA_O_B, EMB), mask)
    out2 = _layer_norm(out1 + dec, brow(ROW_N1G, EMB), brow(ROW_N1B, EMB))

    # cross-attention with encoder output -> norm2(residual)
    q = jnp.dot(out2, w_ref[:, W_CA_Q],
                preferred_element_type=jnp.float32) + brow(ROW_CA_Q_B, EMB)
    kv = jnp.dot(enc, w_ref[:, W_CA_KV],
                 preferred_element_type=jnp.float32) + brow(ROW_CA_KV_B, 2 * EMB)
    out3 = _mha(q, kv[:, 0:EMB], kv[:, EMB:2 * EMB],
                w_ref[:, W_CA_WO], brow(ROW_CA_O_B, EMB), None)
    out4 = _layer_norm(out2 + out3, brow(ROW_N2G, EMB), brow(ROW_N2B, EMB))

    # feed-forward (Linear -> ReLU -> Linear) -> norm3(residual)
    # TODO(synk): FeedForward class not given in the source; assumed the standard
    # Linear(E,F) -> ReLU -> Linear(F,E) transformer FFN.
    h = jnp.maximum(
        jnp.dot(out4, w_ref[:, W_FF1],
                preferred_element_type=jnp.float32) + brow(ROW_FF1_B, FF), 0.0)
    out5 = jnp.dot(h, w2t_ref[...],
                   preferred_element_type=jnp.float32) + brow(ROW_FF2_B, EMB)
    y = _layer_norm(out4 + out5, brow(ROW_N3G, EMB), brow(ROW_N3B, EMB))

    out_ref[...] = y


# ---------------------------------------------------------------------------
# Wrapper: single invocation, whole arrays resident in VMEM (no grid).
# ---------------------------------------------------------------------------
def decoder_block(dec, enc, mask, w_slab, b_slab, w2_t):
    n, k, e = dec.shape
    m = n * k
    vmem = lambda: pl.BlockSpec(memory_space=pltpu.MemorySpace.VMEM)
    out_flat = pl.pallas_call(
        decoder_block_kernel,
        out_shape=jax.ShapeDtypeStruct((m, e), jnp.float32),
        in_specs=[vmem() for _ in range(6)],
        out_specs=vmem(),
    )(dec.reshape(m, e), enc.reshape(m, e), mask, w_slab, b_slab, w2_t)
    return out_flat.reshape(n, k, e)


# ---------------------------------------------------------------------------
# Deterministic raw parameters (math layout: y = x @ W + b).
# ---------------------------------------------------------------------------
def make_params(key):
    ks = jax.random.split(key, 26)

    def mat(k, shape, scale=0.1):
        return (scale * jax.random.normal(k, shape)).astype(jnp.float32)

    ones = jnp.ones((EMB,), jnp.float32)
    return dict(
        wq_sa=mat(ks[0], (EMB, EMB)), wk_sa=mat(ks[1], (EMB, EMB)),
        wv_sa=mat(ks[2], (EMB, EMB)), wo_sa=mat(ks[3], (EMB, EMB)),
        bq_sa=mat(ks[4], (EMB,)), bk_sa=mat(ks[5], (EMB,)),
        bv_sa=mat(ks[6], (EMB,)), bo_sa=mat(ks[7], (EMB,)),
        wq_ca=mat(ks[8], (EMB, EMB)), wk_ca=mat(ks[9], (EMB, EMB)),
        wv_ca=mat(ks[10], (EMB, EMB)), wo_ca=mat(ks[11], (EMB, EMB)),
        bq_ca=mat(ks[12], (EMB,)), bk_ca=mat(ks[13], (EMB,)),
        bv_ca=mat(ks[14], (EMB,)), bo_ca=mat(ks[15], (EMB,)),
        n1g=ones + mat(ks[16], (EMB,)), n1b=mat(ks[17], (EMB,)),
        n2g=ones + mat(ks[18], (EMB,)), n2b=mat(ks[19], (EMB,)),
        n3g=ones + mat(ks[20], (EMB,)), n3b=mat(ks[21], (EMB,)),
        w1=mat(ks[22], (EMB, FF)), b1=mat(ks[23], (FF,)),
        w2=mat(ks[24], (FF, EMB)), b2=mat(ks[25], (EMB,)),   # w2 already (F, E): out = h @ w2
    )


# ---------------------------------------------------------------------------
# Offline packing: 128-aligned weight slab, sublane-row bias slab, scale folding.
# ---------------------------------------------------------------------------
def pack_params(p):
    def pad_cols(w, width=128):
        return jnp.pad(w, ((0, 0), (0, width - w.shape[1])))

    w_slab = jnp.concatenate([
        pad_cols(jnp.concatenate([p['wq_sa'] * SCALE, p['wk_sa'], p['wv_sa']], axis=1)),
        pad_cols(p['wo_sa']),
        pad_cols(p['wq_ca'] * SCALE),
        pad_cols(jnp.concatenate([p['wk_ca'], p['wv_ca']], axis=1)),
        pad_cols(p['wo_ca']),
        pad_cols(p['w1']),
    ], axis=1)                                   # (EMB, 768)
    assert w_slab.shape == (EMB, W_COLS)

    def row(v, width=128):
        v = v.reshape(1, -1)
        return jnp.pad(v, ((0, 0), (0, width - v.shape[1])))

    b_slab = jnp.concatenate([
        row(jnp.concatenate([p['bq_sa'] * SCALE, p['bk_sa'], p['bv_sa']])),  # row 0
        row(p['bo_sa']),                                                     # row 1
        row(p['bq_ca'] * SCALE),                                             # row 2
        row(jnp.concatenate([p['bk_ca'], p['bv_ca']])),                      # row 3
        row(p['bo_ca']),                                                     # row 4
        row(p['n1g']), row(p['n1b']),                                        # rows 5, 6
        row(p['n2g']), row(p['n2b']),                                        # rows 7, 8
        row(p['n3g']), row(p['n3b']),                                        # rows 9, 10
        row(p['b1']),                                                        # row 11
        row(p['b2']),                                                        # row 12
        jnp.zeros((3, 128), jnp.float32),                                    # pad to 16 rows
    ], axis=0)                                   # (16, 128)
    assert b_slab.shape == (B_ROWS, 128)

    return w_slab, b_slab, p['w2']


# ---------------------------------------------------------------------------
# Pure-JAX reference: independent structure on the RAW (unscaled, unpacked)
# parameters -- per-batch vmap, per-head loop, exact softmax, sqrt LayerNorm.
# ---------------------------------------------------------------------------
def reference_forward(dec, enc, mask, p):
    def ln(x, g, b):
        mu = x.mean(-1, keepdims=True)
        var = ((x - mu) ** 2).mean(-1, keepdims=True)
        return (x - mu) / jnp.sqrt(var + EPS) * g + b

    def mha(xq, xkv, wq, bq, wk, bk, wv, bv, wo, bo, msk):
        q = xq @ wq + bq
        k = xkv @ wk + bk
        v = xkv @ wv + bv
        outs = []
        for h in range(NUM_HEADS):
            sl = slice(h * HEAD_DIM, (h + 1) * HEAD_DIM)
            s = (q[:, sl] @ k[:, sl].T) * SCALE
            if msk is not None:
                s = s + msk
            prob = jax.nn.softmax(s, axis=-1)
            outs.append(prob @ v[:, sl])
        return jnp.concatenate(outs, axis=-1) @ wo + bo

    def one(d, e_):
        out1 = mha(d, d, p['wq_sa'], p['bq_sa'], p['wk_sa'], p['bk_sa'],
                   p['wv_sa'], p['bv_sa'], p['wo_sa'], p['bo_sa'], mask)
        out2 = ln(out1 + d, p['n1g'], p['n1b'])
        out3 = mha(out2, e_, p['wq_ca'], p['bq_ca'], p['wk_ca'], p['bk_ca'],
                   p['wv_ca'], p['bv_ca'], p['wo_ca'], p['bo_ca'], None)
        out4 = ln(out2 + out3, p['n2g'], p['n2b'])
        hmid = jnp.maximum(out4 @ p['w1'] + p['b1'], 0.0)
        out5 = hmid @ p['w2'] + p['b2']
        return ln(out4 + out5, p['n3g'], p['n3b'])

    return jax.vmap(one)(dec, enc)


if __name__ == "__main__":
    key = jax.random.PRNGKey(0)
    k_dec, k_enc, k_par = jax.random.split(key, 3)

    dec_inp = jax.random.normal(k_dec, (BATCH, SEQ, EMB), jnp.float32)
    enc_inp = jax.random.normal(k_enc, (BATCH, SEQ, EMB), jnp.float32)
    # Causal additive float mask, as passed to nn.MultiheadAttention(attn_mask=...).
    causal = jnp.tril(jnp.ones((SEQ, SEQ), dtype=bool))
    mask = jnp.where(causal, 0.0, -1e9).astype(jnp.float32)

    params = make_params(k_par)
    w_slab, b_slab, w2_t = pack_params(params)

    y = decoder_block(dec_inp, enc_inp, mask, w_slab, b_slab, w2_t)
    y = jax.block_until_ready(y)

    y_ref = reference_forward(dec_inp, enc_inp, mask, params)
    assert y.shape == (BATCH, SEQ, EMB)
    # 2e-3 tolerance: the kernel uses the approximate EUP reciprocal for the softmax
    # normalisation (pl.reciprocal(..., approx=True)); everything else is exact f32.
    assert jnp.allclose(y, y_ref, rtol=2e-3, atol=2e-3), "Pallas kernel mismatch vs JAX reference"

    print("KERNEL_OK")
</pallas_src>

<mosaic_0001>
module attributes {stable_mosaic.version = 11 : i64} {
  func.func @decoder_block_kernel(%arg0: memref<16x32xf32, #tpu.memory_space<vmem>>, %arg1: memref<16x32xf32, #tpu.memory_space<vmem>>, %arg2: memref<8x8xf32, #tpu.memory_space<vmem>>, %arg3: memref<32x768xf32, #tpu.memory_space<vmem>>, %arg4: memref<16x128xf32, #tpu.memory_space<vmem>>, %arg5: memref<64x32xf32, #tpu.memory_space<vmem>>, %arg6: memref<16x32xf32, #tpu.memory_space<vmem>>) attributes {dimension_semantics = [], scalar_prefetch = 0 : i64, scratch_operands = 0 : i64, tpu.core_type = #tpu.core_type<tc>} {
    %c0 = arith.constant 0 : index
    %c0_0 = arith.constant 0 : index
    %0 = vector.load %arg0[%c0, %c0_0] : memref<16x32xf32, #tpu.memory_space<vmem>>, vector<16x32xf32>
    %c0_1 = arith.constant 0 : index
    %c0_2 = arith.constant 0 : index
    %1 = vector.load %arg1[%c0_1, %c0_2] : memref<16x32xf32, #tpu.memory_space<vmem>>, vector<16x32xf32>
    %c0_3 = arith.constant 0 : index
    %c0_4 = arith.constant 0 : index
    %2 = vector.load %arg2[%c0_3, %c0_4] : memref<8x8xf32, #tpu.memory_space<vmem>>, vector<8x8xf32>
    %c0_5 = arith.constant 0 : index
    %c0_6 = arith.constant 0 : index
    %3 = vector.load %arg3[%c0_5, %c0_6] : memref<32x768xf32, #tpu.memory_space<vmem>>, vector<32x96xf32>
    %cst = arith.constant dense<0.000000e+00> : vector<16x96xf32>
    %4 = tpu.matmul %0, %3, %cst {dimension_numbers = #tpu.dot_dimension_numbers<[1], [0], [0], [1], [0, 0, 1, 1], [], []>} : vector<16x32xf32>, vector<32x96xf32>, vector<16x96xf32> -> vector<16x96xf32>
    %c0_7 = arith.constant 0 : index
    %c0_8 = arith.constant 0 : index
    %5 = vector.load %arg4[%c0_7, %c0_8] : memref<16x128xf32, #tpu.memory_space<vmem>>, vector<1x96xf32>
    %6 = vector.broadcast %5 : vector<1x96xf32> to vector<16x96xf32>
    %7 = arith.addf %4, %6 : vector<16x96xf32>
    %8 = vector.extract_strided_slice %7 {offsets = [0, 0], sizes = [16, 32], strides = [1, 1]} : vector<16x96xf32> to vector<16x32xf32>
    %9 = vector.extract_strided_slice %7 {offsets = [0, 32], sizes = [16, 32], strides = [1, 1]} : vector<16x96xf32> to vector<16x32xf32>
    %10 = vector.extract_strided_slice %7 {offsets = [0, 64], sizes = [16, 32], strides = [1, 1]} : vector<16x96xf32> to vector<16x32xf32>
    %c0_9 = arith.constant 0 : index
    %c128 = arith.constant 128 : index
    %11 = vector.load %arg3[%c0_9, %c128] : memref<32x768xf32, #tpu.memory_space<vmem>>, vector<32x32xf32>
    %c1 = arith.constant 1 : index
    %c0_10 = arith.constant 0 : index
    %12 = vector.load %arg4[%c1, %c0_10] : memref<16x128xf32, #tpu.memory_space<vmem>>, vector<1x32xf32>
    %13 = vector.shape_cast %8 : vector<16x32xf32> to vector<2x8x32xf32>
    %14 = vector.shape_cast %9 : vector<16x32xf32> to vector<2x8x32xf32>
    %15 = vector.shape_cast %10 : vector<16x32xf32> to vector<2x8x32xf32>
    %16 = vector.extract_strided_slice %13 {offsets = [0, 0, 0], sizes = [2, 8, 8], strides = [1, 1, 1]} : vector<2x8x32xf32> to vector<2x8x8xf32>
    %17 = vector.extract_strided_slice %14 {offsets = [0, 0, 0], sizes = [2, 8, 8], strides = [1, 1, 1]} : vector<2x8x32xf32> to vector<2x8x8xf32>
    "tpu.trace_start"() <{level = 10 : i32, message = "nqd,nkd->nqk"}> : () -> ()
    %cst_11 = arith.constant dense<0.000000e+00> : vector<2x8x8xf32>
    %18 = tpu.matmul %16, %17, %cst_11 {dimension_numbers = #tpu.dot_dimension_numbers<[2], [2], [1], [1], [0, 0, 0, 1, 1, 1], [0], [0]>} : vector<2x8x8xf32>, vector<2x8x8xf32>, vector<2x8x8xf32> -> vector<2x8x8xf32>
    "tpu.trace_stop"() : () -> ()
    %19 = vector.shape_cast %2 : vector<8x8xf32> to vector<1x8x8xf32>
    %20 = vector.broadcast %19 : vector<1x8x8xf32> to vector<2x8x8xf32>
    %21 = arith.addf %18, %20 : vector<2x8x8xf32>
    %cst_12 = arith.constant dense<0xFF800000> : vector<2x8xf32>
    %22 = vector.multi_reduction <maximumf>, %21, %cst_12 [2] : vector<2x8x8xf32> to vector<2x8xf32>
    %23 = vector.shape_cast %22 : vector<2x8xf32> to vector<2x8x1xf32>
    %24 = vector.broadcast %23 : vector<2x8x1xf32> to vector<2x8x8xf32>
    %25 = arith.subf %21, %24 : vector<2x8x8xf32>
    %26 = math.exp %25 : vector<2x8x8xf32>
    %cst_13 = arith.constant dense<0.000000e+00> : vector<2x8xf32>
    %27 = vector.multi_reduction <add>, %26, %cst_13 [2] : vector<2x8x8xf32> to vector<2x8xf32>
    %28 = vector.shape_cast %27 : vector<2x8xf32> to vector<2x8x1xf32>
    %29 = tpu.reciprocal %28 {approx = true} : vector<2x8x1xf32> -> vector<2x8x1xf32>
    %30 = vector.broadcast %29 : vector<2x8x1xf32> to vector<2x8x8xf32>
    %31 = arith.mulf %26, %30 : vector<2x8x8xf32>
    %32 = vector.extract_strided_slice %15 {offsets = [0, 0, 0], sizes = [2, 8, 8], strides = [1, 1, 1]} : vector<2x8x32xf32> to vector<2x8x8xf32>
    "tpu.trace_start"() <{level = 10 : i32, message = "nqk,nkd->nqd"}> : () -> ()
    %cst_14 = arith.constant dense<0.000000e+00> : vector<2x8x8xf32>
    %33 = tpu.matmul %31, %32, %cst_14 {dimension_numbers = #tpu.dot_dimension_numbers<[2], [1], [1], [2], [0, 0, 0, 1, 1, 2], [0], [0]>} : vector<2x8x8xf32>, vector<2x8x8xf32>, vector<2x8x8xf32> -> vector<2x8x8xf32>
    "tpu.trace_stop"() : () -> ()
    %34 = vector.shape_cast %33 : vector<2x8x8xf32> to vector<16x8xf32>
    %35 = vector.extract_strided_slice %11 {offsets = [0, 0], sizes = [8, 32], strides = [1, 1]} : vector<32x32xf32> to vector<8x32xf32>
    %cst_15 = arith.constant dense<0.000000e+00> : vector<16x32xf32>
    %36 = tpu.matmul %34, %35, %cst_15 {dimension_numbers = #tpu.dot_dimension_numbers<[1], [0], [0], [1], [0, 0, 1, 1], [], []>} : vector<16x8xf32>, vector<8x32xf32>, vector<16x32xf32> -> vector<16x32xf32>
    %37 = vector.extract_strided_slice %13 {offsets = [0, 0, 8], sizes = [2, 8, 8], strides = [1, 1, 1]} : vector<2x8x32xf32> to vector<2x8x8xf32>
    %38 = vector.extract_strided_slice %14 {offsets = [0, 0, 8], sizes = [2, 8, 8], strides = [1, 1, 1]} : vector<2x8x32xf32> to vector<2x8x8xf32>
    "tpu.trace_start"() <{level = 10 : i32, message = "nqd,nkd->nqk"}> : () -> ()
    %cst_16 = arith.constant dense<0.000000e+00> : vector<2x8x8xf32>
    %39 = tpu.matmul %37, %38, %cst_16 {dimension_numbers = #tpu.dot_dimension_numbers<[2], [2], [1], [1], [0, 0, 0, 1, 1, 1], [0], [0]>} : vector<2x8x8xf32>, vector<2x8x8xf32>, vector<2x8x8xf32> -> vector<2x8x8xf32>
    "tpu.trace_stop"() : () -> ()
    %40 = vector.shape_cast %2 : vector<8x8xf32> to vector<1x8x8xf32>
    %41 = vector.broadcast %40 : vector<1x8x8xf32> to vector<2x8x8xf32>
    %42 = arith.addf %39, %41 : vector<2x8x8xf32>
    %cst_17 = arith.constant dense<0xFF800000> : vector<2x8xf32>
    %43 = vector.multi_reduction <maximumf>, %42, %cst_17 [2] : vector<2x8x8xf32> to vector<2x8xf32>
    %44 = vector.shape_cast %43 : vector<2x8xf32> to vector<2x8x1xf32>
    %45 = vector.broadcast %44 : vector<2x8x1xf32> to vector<2x8x8xf32>
    %46 = arith.subf %42, %45 : vector<2x8x8xf32>
    %47 = math.exp %46 : vector<2x8x8xf32>
    %cst_18 = arith.constant dense<0.000000e+00> : vector<2x8xf32>
    %48 = vector.multi_reduction <add>, %47, %cst_18 [2] : vector<2x8x8xf32> to vector<2x8xf32>
    %49 = vector.shape_cast %48 : vector<2x8xf32> to vector<2x8x1xf32>
    %50 = tpu.reciprocal %49 {approx = true} : vector<2x8x1xf32> -> vector<2x8x1xf32>
    %51 = vector.broadcast %50 : vector<2x8x1xf32> to vector<2x8x8xf32>
    %52 = arith.mulf %47, %51 : vector<2x8x8xf32>
    %53 = vector.extract_strided_slice %15 {offsets = [0, 0, 8], sizes = [2, 8, 8], strides = [1, 1, 1]} : vector<2x8x32xf32> to vector<2x8x8xf32>
    "tpu.trace_start"() <{level = 10 : i32, message = "nqk,nkd->nqd"}> : () -> ()
    %cst_19 = arith.constant dense<0.000000e+00> : vector<2x8x8xf32>
    %54 = tpu.matmul %52, %53, %cst_19 {dimension_numbers = #tpu.dot_dimension_numbers<[2], [1], [1], [2], [0, 0, 0, 1, 1, 2], [0], [0]>} : vector<2x8x8xf32>, vector<2x8x8xf32>, vector<2x8x8xf32> -> vector<2x8x8xf32>
    "tpu.trace_stop"() : () -> ()
    %55 = vector.shape_cast %54 : vector<2x8x8xf32> to vector<16x8xf32>
    %56 = vector.extract_strided_slice %11 {offsets = [8, 0], sizes = [8, 32], strides = [1, 1]} : vector<32x32xf32> to vector<8x32xf32>
    %cst_20 = arith.constant dense<0.000000e+00> : vector<16x32xf32>
    %57 = tpu.matmul %55, %56, %cst_20 {dimension_numbers = #tpu.dot_dimension_numbers<[1], [0], [0], [1], [0, 0, 1, 1], [], []>} : vector<16x8xf32>, vector<8x32xf32>, vector<16x32xf32> -> vector<16x32xf32>
    %58 = arith.addf %36, %57 : vector<16x32xf32>
    %59 = vector.extract_strided_slice %13 {offsets = [0, 0, 16], sizes = [2, 8, 8], strides = [1, 1, 1]} : vector<2x8x32xf32> to vector<2x8x8xf32>
    %60 = vector.extract_strided_slice %14 {offsets = [0, 0, 16], sizes = [2, 8, 8], strides = [1, 1, 1]} : vector<2x8x32xf32> to vector<2x8x8xf32>
    "tpu.trace_start"() <{level = 10 : i32, message = "nqd,nkd->nqk"}> : () -> ()
    %cst_21 = arith.constant dense<0.000000e+00> : vector<2x8x8xf32>
    %61 = tpu.matmul %59, %60, %cst_21 {dimension_numbers = #tpu.dot_dimension_numbers<[2], [2], [1], [1], [0, 0, 0, 1, 1, 1], [0], [0]>} : vector<2x8x8xf32>, vector<2x8x8xf32>, vector<2x8x8xf32> -> vector<2x8x8xf32>
    "tpu.trace_stop"() : () -> ()
    %62 = vector.shape_cast %2 : vector<8x8xf32> to vector<1x8x8xf32>
    %63 = vector.broadcast %62 : vector<1x8x8xf32> to vector<2x8x8xf32>
    %64 = arith.addf %61, %63 : vector<2x8x8xf32>
    %cst_22 = arith.constant dense<0xFF800000> : vector<2x8xf32>
    %65 = vector.multi_reduction <maximumf>, %64, %cst_22 [2] : vector<2x8x8xf32> to vector<2x8xf32>
    %66 = vector.shape_cast %65 : vector<2x8xf32> to vector<2x8x1xf32>
    %67 = vector.broadcast %66 : vector<2x8x1xf32> to vector<2x8x8xf32>
    %68 = arith.subf %64, %67 : vector<2x8x8xf32>
    %69 = math.exp %68 : vector<2x8x8xf32>
    %cst_23 = arith.constant dense<0.000000e+00> : vector<2x8xf32>
    %70 = vector.multi_reduction <add>, %69, %cst_23 [2] : vector<2x8x8xf32> to vector<2x8xf32>
    %71 = vector.shape_cast %70 : vector<2x8xf32> to vector<2x8x1xf32>
    %72 = tpu.reciprocal %71 {approx = true} : vector<2x8x1xf32> -> vector<2x8x1xf32>
    %73 = vector.broadcast %72 : vector<2x8x1xf32> to vector<2x8x8xf32>
    %74 = arith.mulf %69, %73 : vector<2x8x8xf32>
    %75 = vector.extract_strided_slice %15 {offsets = [0, 0, 16], sizes = [2, 8, 8], strides = [1, 1, 1]} : vector<2x8x32xf32> to vector<2x8x8xf32>
    "tpu.trace_start"() <{level = 10 : i32, message = "nqk,nkd->nqd"}> : () -> ()
    %cst_24 = arith.constant dense<0.000000e+00> : vector<2x8x8xf32>
    %76 = tpu.matmul %74, %75, %cst_24 {dimension_numbers = #tpu.dot_dimension_numbers<[2], [1], [1], [2], [0, 0, 0, 1, 1, 2], [0], [0]>} : vector<2x8x8xf32>, vector<2x8x8xf32>, vector<2x8x8xf32> -> vector<2x8x8xf32>
    "tpu.trace_stop"() : () -> ()
    %77 = vector.shape_cast %76 : vector<2x8x8xf32> to vector<16x8xf32>
    %78 = vector.extract_strided_slice %11 {offsets = [16, 0], sizes = [8, 32], strides = [1, 1]} : vector<32x32xf32> to vector<8x32xf32>
    %cst_25 = arith.constant dense<0.000000e+00> : vector<16x32xf32>
    %79 = tpu.matmul %77, %78, %cst_25 {dimension_numbers = #tpu.dot_dimension_numbers<[1], [0], [0], [1], [0, 0, 1, 1], [], []>} : vector<16x8xf32>, vector<8x32xf32>, vector<16x32xf32> -> vector<16x32xf32>
    %80 = arith.addf %58, %79 : vector<16x32xf32>
    %81 = vector.extract_strided_slice %13 {offsets = [0, 0, 24], sizes = [2, 8, 8], strides = [1, 1, 1]} : vector<2x8x32xf32> to vector<2x8x8xf32>
    %82 = vector.extract_strided_slice %14 {offsets = [0, 0, 24], sizes = [2, 8, 8], strides = [1, 1, 1]} : vector<2x8x32xf32> to vector<2x8x8xf32>
    "tpu.trace_start"() <{level = 10 : i32, message = "nqd,nkd->nqk"}> : () -> ()
    %cst_26 = arith.constant dense<0.000000e+00> : vector<2x8x8xf32>
    %83 = tpu.matmul %81, %82, %cst_26 {dimension_numbers = #tpu.dot_dimension_numbers<[2], [2], [1], [1], [0, 0, 0, 1, 1, 1], [0], [0]>} : vector<2x8x8xf32>, vector<2x8x8xf32>, vector<2x8x8xf32> -> vector<2x8x8xf32>
    "tpu.trace_stop"() : () -> ()
    %84 = vector.shape_cast %2 : vector<8x8xf32> to vector<1x8x8xf32>
    %85 = vector.broadcast %84 : vector<1x8x8xf32> to vector<2x8x8xf32>
    %86 = arith.addf %83, %85 : vector<2x8x8xf32>
    %cst_27 = arith.constant dense<0xFF800000> : vector<2x8xf32>
    %87 = vector.multi_reduction <maximumf>, %86, %cst_27 [2] : vector<2x8x8xf32> to vector<2x8xf32>
    %88 = vector.shape_cast %87 : vector<2x8xf32> to vector<2x8x1xf32>
    %89 = vector.broadcast %88 : vector<2x8x1xf32> to vector<2x8x8xf32>
    %90 = arith.subf %86, %89 : vector<2x8x8xf32>
    %91 = math.exp %90 : vector<2x8x8xf32>
    %cst_28 = arith.constant dense<0.000000e+00> : vector<2x8xf32>
    %92 = vector.multi_reduction <add>, %91, %cst_28 [2] : vector<2x8x8xf32> to vector<2x8xf32>
    %93 = vector.shape_cast %92 : vector<2x8xf32> to vector<2x8x1xf32>
    %94 = tpu.reciprocal %93 {approx = true} : vector<2x8x1xf32> -> vector<2x8x1xf32>
    %95 = vector.broadcast %94 : vector<2x8x1xf32> to vector<2x8x8xf32>
    %96 = arith.mulf %91, %95 : vector<2x8x8xf32>
    %97 = vector.extract_strided_slice %15 {offsets = [0, 0, 24], sizes = [2, 8, 8], strides = [1, 1, 1]} : vector<2x8x32xf32> to vector<2x8x8xf32>
    "tpu.trace_start"() <{level = 10 : i32, message = "nqk,nkd->nqd"}> : () -> ()
    %cst_29 = arith.constant dense<0.000000e+00> : vector<2x8x8xf32>
    %98 = tpu.matmul %96, %97, %cst_29 {dimension_numbers = #tpu.dot_dimension_numbers<[2], [1], [1], [2], [0, 0, 0, 1, 1, 2], [0], [0]>} : vector<2x8x8xf32>, vector<2x8x8xf32>, vector<2x8x8xf32> -> vector<2x8x8xf32>
    "tpu.trace_stop"() : () -> ()
    %99 = vector.shape_cast %98 : vector<2x8x8xf32> to vector<16x8xf32>
    %100 = vector.extract_strided_slice %11 {offsets = [24, 0], sizes = [8, 32], strides = [1, 1]} : vector<32x32xf32> to vector<8x32xf32>
    %cst_30 = arith.constant dense<0.000000e+00> : vector<16x32xf32>
    %101 = tpu.matmul %99, %100, %cst_30 {dimension_numbers = #tpu.dot_dimension_numbers<[1], [0], [0], [1], [0, 0, 1, 1], [], []>} : vector<16x8xf32>, vector<8x32xf32>, vector<16x32xf32> -> vector<16x32xf32>
    %102 = arith.addf %80, %101 : vector<16x32xf32>
    %103 = vector.broadcast %12 : vector<1x32xf32> to vector<16x32xf32>
    %104 = arith.addf %102, %103 : vector<16x32xf32>
    %105 = arith.addf %104, %0 : vector<16x32xf32>
    %c5 = arith.constant 5 : index
    %c0_31 = arith.constant 0 : index
    %106 = vector.load %arg4[%c5, %c0_31] : memref<16x128xf32, #tpu.memory_space<vmem>>, vector<1x32xf32>
    %c6 = arith.constant 6 : index
    %c0_32 = arith.constant 0 : index
    %107 = vector.load %arg4[%c6, %c0_32] : memref<16x128xf32, #tpu.memory_space<vmem>>, vector<1x32xf32>
    %cst_33 = arith.constant dense<0.000000e+00> : vector<16xf32>
    %108 = vector.multi_reduction <add>, %105, %cst_33 [1] : vector<16x32xf32> to vector<16xf32>
    %109 = vector.shape_cast %108 : vector<16xf32> to vector<16x1xf32>
    %cst_34 = arith.constant 3.200000e+01 : f32
    %110 = vector.broadcast %cst_34 : f32 to vector<16x1xf32>
    %111 = arith.divf %109, %110 : vector<16x1xf32>
    %112 = vector.broadcast %111 : vector<16x1xf32> to vector<16x32xf32>
    %113 = arith.subf %105, %112 : vector<16x32xf32>
    %114 = arith.mulf %113, %113 : vector<16x32xf32>
    %cst_35 = arith.constant dense<0.000000e+00> : vector<16xf32>
    %115 = vector.multi_reduction <add>, %114, %cst_35 [1] : vector<16x32xf32> to vector<16xf32>
    %116 = vector.shape_cast %115 : vector<16xf32> to vector<16x1xf32>
    %cst_36 = arith.constant 3.200000e+01 : f32
    %117 = vector.broadcast %cst_36 : f32 to vector<16x1xf32>
    %118 = arith.divf %116, %117 : vector<16x1xf32>
    %119 = vector.broadcast %111 : vector<16x1xf32> to vector<16x32xf32>
    %120 = arith.subf %105, %119 : vector<16x32xf32>
    %cst_37 = arith.constant 9.99999974E-6 : f32
    %121 = vector.broadcast %cst_37 : f32 to vector<16x1xf32>
    %122 = arith.addf %118, %121 : vector<16x1xf32>
    %123 = math.rsqrt %122 : vector<16x1xf32>
    %124 = vector.broadcast %123 : vector<16x1xf32> to vector<16x32xf32>
    %125 = arith.mulf %120, %124 : vector<16x32xf32>
    %126 = vector.broadcast %106 : vector<1x32xf32> to vector<16x32xf32>
    %127 = arith.mulf %125, %126 : vector<16x32xf32>
    %128 = vector.broadcast %107 : vector<1x32xf32> to vector<16x32xf32>
    %129 = arith.addf %127, %128 : vector<16x32xf32>
    %c0_38 = arith.constant 0 : index
    %c256 = arith.constant 256 : index
    %130 = vector.load %arg3[%c0_38, %c256] : memref<32x768xf32, #tpu.memory_space<vmem>>, vector<32x32xf32>
    %cst_39 = arith.constant dense<0.000000e+00> : vector<16x32xf32>
    %131 = tpu.matmul %129, %130, %cst_39 {dimension_numbers = #tpu.dot_dimension_numbers<[1], [0], [0], [1], [0, 0, 1, 1], [], []>} : vector<16x32xf32>, vector<32x32xf32>, vector<16x32xf32> -> vector<16x32xf32>
    %c2 = arith.constant 2 : index
    %c0_40 = arith.constant 0 : index
    %132 = vector.load %arg4[%c2, %c0_40] : memref<16x128xf32, #tpu.memory_space<vmem>>, vector<1x32xf32>
    %133 = vector.broadcast %132 : vector<1x32xf32> to vector<16x32xf32>
    %134 = arith.addf %131, %133 : vector<16x32xf32>
    %c0_41 = arith.constant 0 : index
    %c384 = arith.constant 384 : index
    %135 = vector.load %arg3[%c0_41, %c384] : memref<32x768xf32, #tpu.memory_space<vmem>>, vector<32x64xf32>
    %cst_42 = arith.constant dense<0.000000e+00> : vector<16x64xf32>
    %136 = tpu.matmul %1, %135, %cst_42 {dimension_numbers = #tpu.dot_dimension_numbers<[1], [0], [0], [1], [0, 0, 1, 1], [], []>} : vector<16x32xf32>, vector<32x64xf32>, vector<16x64xf32> -> vector<16x64xf32>
    %c3 = arith.constant 3 : index
    %c0_43 = arith.constant 0 : index
    %137 = vector.load %arg4[%c3, %c0_43] : memref<16x128xf32, #tpu.memory_space<vmem>>, vector<1x64xf32>
    %138 = vector.broadcast %137 : vector<1x64xf32> to vector<16x64xf32>
    %139 = arith.addf %136, %138 : vector<16x64xf32>
    %140 = vector.extract_strided_slice %139 {offsets = [0, 0], sizes = [16, 32], strides = [1, 1]} : vector<16x64xf32> to vector<16x32xf32>
    %141 = vector.extract_strided_slice %139 {offsets = [0, 32], sizes = [16, 32], strides = [1, 1]} : vector<16x64xf32> to vector<16x32xf32>
    %c0_44 = arith.constant 0 : index
    %c512 = arith.constant 512 : index
    %142 = vector.load %arg3[%c0_44, %c512] : memref<32x768xf32, #tpu.memory_space<vmem>>, vector<32x32xf32>
    %c4 = arith.constant 4 : index
    %c0_45 = arith.constant 0 : index
    %143 = vector.load %arg4[%c4, %c0_45] : memref<16x128xf32, #tpu.memory_space<vmem>>, vector<1x32xf32>
    %144 = vector.shape_cast %134 : vector<16x32xf32> to vector<2x8x32xf32>
    %145 = vector.shape_cast %140 : vector<16x32xf32> to vector<2x8x32xf32>
    %146 = vector.shape_cast %141 : vector<16x32xf32> to vector<2x8x32xf32>
    %147 = vector.extract_strided_slice %144 {offsets = [0, 0, 0], sizes = [2, 8, 8], strides = [1, 1, 1]} : vector<2x8x32xf32> to vector<2x8x8xf32>
    %148 = vector.extract_strided_slice %145 {offsets = [0, 0, 0], sizes = [2, 8, 8], strides = [1, 1, 1]} : vector<2x8x32xf32> to vector<2x8x8xf32>
    "tpu.trace_start"() <{level = 10 : i32, message = "nqd,nkd->nqk"}> : () -> ()
    %cst_46 = arith.constant dense<0.000000e+00> : vector<2x8x8xf32>
    %149 = tpu.matmul %147, %148, %cst_46 {dimension_numbers = #tpu.dot_dimension_numbers<[2], [2], [1], [1], [0, 0, 0, 1, 1, 1], [0], [0]>} : vector<2x8x8xf32>, vector<2x8x8xf32>, vector<2x8x8xf32> -> vector<2x8x8xf32>
    "tpu.trace_stop"() : () -> ()
    %cst_47 = arith.constant dense<0xFF800000> : vector<2x8xf32>
    %150 = vector.multi_reduction <maximumf>, %149, %cst_47 [2] : vector<2x8x8xf32> to vector<2x8xf32>
    %151 = vector.shape_cast %150 : vector<2x8xf32> to vector<2x8x1xf32>
    %152 = vector.broadcast %151 : vector<2x8x1xf32> to vector<2x8x8xf32>
    %153 = arith.subf %149, %152 : vector<2x8x8xf32>
    %154 = math.exp %153 : vector<2x8x8xf32>
    %cst_48 = arith.constant dense<0.000000e+00> : vector<2x8xf32>
    %155 = vector.multi_reduction <add>, %154, %cst_48 [2] : vector<2x8x8xf32> to vector<2x8xf32>
    %156 = vector.shape_cast %155 : vector<2x8xf32> to vector<2x8x1xf32>
    %157 = tpu.reciprocal %156 {approx = true} : vector<2x8x1xf32> -> vector<2x8x1xf32>
    %158 = vector.broadcast %157 : vector<2x8x1xf32> to vector<2x8x8xf32>
    %159 = arith.mulf %154, %158 : vector<2x8x8xf32>
    %160 = vector.extract_strided_slice %146 {offsets = [0, 0, 0], sizes = [2, 8, 8], strides = [1, 1, 1]} : vector<2x8x32xf32> to vector<2x8x8xf32>
    "tpu.trace_start"() <{level = 10 : i32, message = "nqk,nkd->nqd"}> : () -> ()
    %cst_49 = arith.constant dense<0.000000e+00> : vector<2x8x8xf32>
    %161 = tpu.matmul %159, %160, %cst_49 {dimension_numbers = #tpu.dot_dimension_numbers<[2], [1], [1], [2], [0, 0, 0, 1, 1, 2], [0], [0]>} : vector<2x8x8xf32>, vector<2x8x8xf32>, vector<2x8x8xf32> -> vector<2x8x8xf32>
    "tpu.trace_stop"() : () -> ()
    %162 = vector.shape_cast %161 : vector<2x8x8xf32> to vector<16x8xf32>
    %163 = vector.extract_strided_slice %142 {offsets = [0, 0], sizes = [8, 32], strides = [1, 1]} : vector<32x32xf32> to vector<8x32xf32>
    %cst_50 = arith.constant dense<0.000000e+00> : vector<16x32xf32>
    %164 = tpu.matmul %162, %163, %cst_50 {dimension_numbers = #tpu.dot_dimension_numbers<[1], [0], [0], [1], [0, 0, 1, 1], [], []>} : vector<16x8xf32>, vector<8x32xf32>, vector<16x32xf32> -> vector<16x32xf32>
    %165 = vector.extract_strided_slice %144 {offsets = [0, 0, 8], sizes = [2, 8, 8], strides = [1, 1, 1]} : vector<2x8x32xf32> to vector<2x8x8xf32>
    %166 = vector.extract_strided_slice %145 {offsets = [0, 0, 8], sizes = [2, 8, 8], strides = [1, 1, 1]} : vector<2x8x32xf32> to vector<2x8x8xf32>
    "tpu.trace_start"() <{level = 10 : i32, message = "nqd,nkd->nqk"}> : () -> ()
    %cst_51 = arith.constant dense<0.000000e+00> : vector<2x8x8xf32>
    %167 = tpu.matmul %165, %166, %cst_51 {dimension_numbers = #tpu.dot_dimension_numbers<[2], [2], [1], [1], [0, 0, 0, 1, 1, 1], [0], [0]>} : vector<2x8x8xf32>, vector<2x8x8xf32>, vector<2x8x8xf32> -> vector<2x8x8xf32>
    "tpu.trace_stop"() : () -> ()
    %cst_52 = arith.constant dense<0xFF800000> : vector<2x8xf32>
    %168 = vector.multi_reduction <maximumf>, %167, %cst_52 [2] : vector<2x8x8xf32> to vector<2x8xf32>
    %169 = vector.shape_cast %168 : vector<2x8xf32> to vector<2x8x1xf32>
    %170 = vector.broadcast %169 : vector<2x8x1xf32> to vector<2x8x8xf32>
    %171 = arith.subf %167, %170 : vector<2x8x8xf32>
    %172 = math.exp %171 : vector<2x8x8xf32>
    %cst_53 = arith.constant dense<0.000000e+00> : vector<2x8xf32>
    %173 = vector.multi_reduction <add>, %172, %cst_53 [2] : vector<2x8x8xf32> to vector<2x8xf32>
    %174 = vector.shape_cast %173 : vector<2x8xf32> to vector<2x8x1xf32>
    %175 = tpu.reciprocal %174 {approx = true} : vector<2x8x1xf32> -> vector<2x8x1xf32>
    %176 = vector.broadcast %175 : vector<2x8x1xf32> to vector<2x8x8xf32>
    %177 = arith.mulf %172, %176 : vector<2x8x8xf32>
    %178 = vector.extract_strided_slice %146 {offsets = [0, 0, 8], sizes = [2, 8, 8], strides = [1, 1, 1]} : vector<2x8x32xf32> to vector<2x8x8xf32>
    "tpu.trace_start"() <{level = 10 : i32, message = "nqk,nkd->nqd"}> : () -> ()
    %cst_54 = arith.constant dense<0.000000e+00> : vector<2x8x8xf32>
    %179 = tpu.matmul %177, %178, %cst_54 {dimension_numbers = #tpu.dot_dimension_numbers<[2], [1], [1], [2], [0, 0, 0, 1, 1, 2], [0], [0]>} : vector<2x8x8xf32>, vector<2x8x8xf32>, vector<2x8x8xf32> -> vector<2x8x8xf32>
    "tpu.trace_stop"() : () -> ()
    %180 = vector.shape_cast %179 : vector<2x8x8xf32> to vector<16x8xf32>
    %181 = vector.extract_strided_slice %142 {offsets = [8, 0], sizes = [8, 32], strides = [1, 1]} : vector<32x32xf32> to vector<8x32xf32>
    %cst_55 = arith.constant dense<0.000000e+00> : vector<16x32xf32>
    %182 = tpu.matmul %180, %181, %cst_55 {dimension_numbers = #tpu.dot_dimension_numbers<[1], [0], [0], [1], [0, 0, 1, 1], [], []>} : vector<16x8xf32>, vector<8x32xf32>, vector<16x32xf32> -> vector<16x32xf32>
    %183 = arith.addf %164, %182 : vector<16x32xf32>
    %184 = vector.extract_strided_slice %144 {offsets = [0, 0, 16], sizes = [2, 8, 8], strides = [1, 1, 1]} : vector<2x8x32xf32> to vector<2x8x8xf32>
    %185 = vector.extract_strided_slice %145 {offsets = [0, 0, 16], sizes = [2, 8, 8], strides = [1, 1, 1]} : vector<2x8x32xf32> to vector<2x8x8xf32>
    "tpu.trace_start"() <{level = 10 : i32, message = "nqd,nkd->nqk"}> : () -> ()
    %cst_56 = arith.constant dense<0.000000e+00> : vector<2x8x8xf32>
    %186 = tpu.matmul %184, %185, %cst_56 {dimension_numbers = #tpu.dot_dimension_numbers<[2], [2], [1], [1], [0, 0, 0, 1, 1, 1], [0], [0]>} : vector<2x8x8xf32>, vector<2x8x8xf32>, vector<2x8x8xf32> -> vector<2x8x8xf32>
    "tpu.trace_stop"() : () -> ()
    %cst_57 = arith.constant dense<0xFF800000> : vector<2x8xf32>
    %187 = vector.multi_reduction <maximumf>, %186, %cst_57 [2] : vector<2x8x8xf32> to vector<2x8xf32>
    %188 = vector.shape_cast %187 : vector<2x8xf32> to vector<2x8x1xf32>
    %189 = vector.broadcast %188 : vector<2x8x1xf32> to vector<2x8x8xf32>
    %190 = arith.subf %186, %189 : vector<2x8x8xf32>
    %191 = math.exp %190 : vector<2x8x8xf32>
    %cst_58 = arith.constant dense<0.000000e+00> : vector<2x8xf32>
    %192 = vector.multi_reduction <add>, %191, %cst_58 [2] : vector<2x8x8xf32> to vector<2x8xf32>
    %193 = vector.shape_cast %192 : vector<2x8xf32> to vector<2x8x1xf32>
    %194 = tpu.reciprocal %193 {approx = true} : vector<2x8x1xf32> -> vector<2x8x1xf32>
    %195 = vector.broadcast %194 : vector<2x8x1xf32> to vector<2x8x8xf32>
    %196 = arith.mulf %191, %195 : vector<2x8x8xf32>
    %197 = vector.extract_strided_slice %146 {offsets = [0, 0, 16], sizes = [2, 8, 8], strides = [1, 1, 1]} : vector<2x8x32xf32> to vector<2x8x8xf32>
    "tpu.trace_start"() <{level = 10 : i32, message = "nqk,nkd->nqd"}> : () -> ()
    %cst_59 = arith.constant dense<0.000000e+00> : vector<2x8x8xf32>
    %198 = tpu.matmul %196, %197, %cst_59 {dimension_numbers = #tpu.dot_dimension_numbers<[2], [1], [1], [2], [0, 0, 0, 1, 1, 2], [0], [0]>} : vector<2x8x8xf32>, vector<2x8x8xf32>, vector<2x8x8xf32> -> vector<2x8x8xf32>
    "tpu.trace_stop"() : () -> ()
    %199 = vector.shape_cast %198 : vector<2x8x8xf32> to vector<16x8xf32>
    %200 = vector.extract_strided_slice %142 {offsets = [16, 0], sizes = [8, 32], strides = [1, 1]} : vector<32x32xf32> to vector<8x32xf32>
    %cst_60 = arith.constant dense<0.000000e+00> : vector<16x32xf32>
    %201 = tpu.matmul %199, %200, %cst_60 {dimension_numbers = #tpu.dot_dimension_numbers<[1], [0], [0], [1], [0, 0, 1, 1], [], []>} : vector<16x8xf32>, vector<8x32xf32>, vector<16x32xf32> -> vector<16x32xf32>
    %202 = arith.addf %183, %201 : vector<16x32xf32>
    %203 = vector.extract_strided_slice %144 {offsets = [0, 0, 24], sizes = [2, 8, 8], strides = [1, 1, 1]} : vector<2x8x32xf32> to vector<2x8x8xf32>
    %204 = vector.extract_strided_slice %145 {offsets = [0, 0, 24], sizes = [2, 8, 8], strides = [1, 1, 1]} : vector<2x8x32xf32> to vector<2x8x8xf32>
    "tpu.trace_start"() <{level = 10 : i32, message = "nqd,nkd->nqk"}> : () -> ()
    %cst_61 = arith.constant dense<0.000000e+00> : vector<2x8x8xf32>
    %205 = tpu.matmul %203, %204, %cst_61 {dimension_numbers = #tpu.dot_dimension_numbers<[2], [2], [1], [1], [0, 0, 0, 1, 1, 1], [0], [0]>} : vector<2x8x8xf32>, vector<2x8x8xf32>, vector<2x8x8xf32> -> vector<2x8x8xf32>
    "tpu.trace_stop"() : () -> ()
    %cst_62 = arith.constant dense<0xFF800000> : vector<2x8xf32>
    %206 = vector.multi_reduction <maximumf>, %205, %cst_62 [2] : vector<2x8x8xf32> to vector<2x8xf32>
    %207 = vector.shape_cast %206 : vector<2x8xf32> to vector<2x8x1xf32>
    %208 = vector.broadcast %207 : vector<2x8x1xf32> to vector<2x8x8xf32>
    %209 = arith.subf %205, %208 : vector<2x8x8xf32>
    %210 = math.exp %209 : vector<2x8x8xf32>
    %cst_63 = arith.constant dense<0.000000e+00> : vector<2x8xf32>
    %211 = vector.multi_reduction <add>, %210, %cst_63 [2] : vector<2x8x8xf32> to vector<2x8xf32>
    %212 = vector.shape_cast %211 : vector<2x8xf32> to vector<2x8x1xf32>
    %213 = tpu.reciprocal %212 {approx = true} : vector<2x8x1xf32> -> vector<2x8x1xf32>
    %214 = vector.broadcast %213 : vector<2x8x1xf32> to vector<2x8x8xf32>
    %215 = arith.mulf %210, %214 : vector<2x8x8xf32>
    %216 = vector.extract_strided_slice %146 {offsets = [0, 0, 24], sizes = [2, 8, 8], strides = [1, 1, 1]} : vector<2x8x32xf32> to vector<2x8x8xf32>
    "tpu.trace_start"() <{level = 10 : i32, message = "nqk,nkd->nqd"}> : () -> ()
    %cst_64 = arith.constant dense<0.000000e+00> : vector<2x8x8xf32>
    %217 = tpu.matmul %215, %216, %cst_64 {dimension_numbers = #tpu.dot_dimension_numbers<[2], [1], [1], [2], [0, 0, 0, 1, 1, 2], [0], [0]>} : vector<2x8x8xf32>, vector<2x8x8xf32>, vector<2x8x8xf32> -> vector<2x8x8xf32>
    "tpu.trace_stop"() : () -> ()
    %218 = vector.shape_cast %217 : vector<2x8x8xf32> to vector<16x8xf32>
    %219 = vector.extract_strided_slice %142 {offsets = [24, 0], sizes = [8, 32], strides = [1, 1]} : vector<32x32xf32> to vector<8x32xf32>
    %cst_65 = arith.constant dense<0.000000e+00> : vector<16x32xf32>
    %220 = tpu.matmul %218, %219, %cst_65 {dimension_numbers = #tpu.dot_dimension_numbers<[1], [0], [0], [1], [0, 0, 1, 1], [], []>} : vector<16x8xf32>, vector<8x32xf32>, vector<16x32xf32> -> vector<16x32xf32>
    %221 = arith.addf %202, %220 : vector<16x32xf32>
    %222 = vector.broadcast %143 : vector<1x32xf32> to vector<16x32xf32>
    %223 = arith.addf %221, %222 : vector<16x32xf32>
    %224 = arith.addf %129, %223 : vector<16x32xf32>
    %c7 = arith.constant 7 : index
    %c0_66 = arith.constant 0 : index
    %225 = vector.load %arg4[%c7, %c0_66] : memref<16x128xf32, #tpu.memory_space<vmem>>, vector<1x32xf32>
    %c8 = arith.constant 8 : index
    %c0_67 = arith.constant 0 : index
    %226 = vector.load %arg4[%c8, %c0_67] : memref<16x128xf32, #tpu.memory_space<vmem>>, vector<1x32xf32>
    %cst_68 = arith.constant dense<0.000000e+00> : vector<16xf32>
    %227 = vector.multi_reduction <add>, %224, %cst_68 [1] : vector<16x32xf32> to vector<16xf32>
    %228 = vector.shape_cast %227 : vector<16xf32> to vector<16x1xf32>
    %cst_69 = arith.constant 3.200000e+01 : f32
    %229 = vector.broadcast %cst_69 : f32 to vector<16x1xf32>
    %230 = arith.divf %228, %229 : vector<16x1xf32>
    %231 = vector.broadcast %230 : vector<16x1xf32> to vector<16x32xf32>
    %232 = arith.subf %224, %231 : vector<16x32xf32>
    %233 = arith.mulf %232, %232 : vector<16x32xf32>
    %cst_70 = arith.constant dense<0.000000e+00> : vector<16xf32>
    %234 = vector.multi_reduction <add>, %233, %cst_70 [1] : vector<16x32xf32> to vector<16xf32>
    %235 = vector.shape_cast %234 : vector<16xf32> to vector<16x1xf32>
    %cst_71 = arith.constant 3.200000e+01 : f32
    %236 = vector.broadcast %cst_71 : f32 to vector<16x1xf32>
    %237 = arith.divf %235, %236 : vector<16x1xf32>
    %238 = vector.broadcast %230 : vector<16x1xf32> to vector<16x32xf32>
    %239 = arith.subf %224, %238 : vector<16x32xf32>
    %cst_72 = arith.constant 9.99999974E-6 : f32
    %240 = vector.broadcast %cst_72 : f32 to vector<16x1xf32>
    %241 = arith.addf %237, %240 : vector<16x1xf32>
    %242 = math.rsqrt %241 : vector<16x1xf32>
    %243 = vector.broadcast %242 : vector<16x1xf32> to vector<16x32xf32>
    %244 = arith.mulf %239, %243 : vector<16x32xf32>
    %245 = vector.broadcast %225 : vector<1x32xf32> to vector<16x32xf32>
    %246 = arith.mulf %244, %245 : vector<16x32xf32>
    %247 = vector.broadcast %226 : vector<1x32xf32> to vector<16x32xf32>
    %248 = arith.addf %246, %247 : vector<16x32xf32>
    %c0_73 = arith.constant 0 : index
    %c640 = arith.constant 640 : index
    %249 = vector.load %arg3[%c0_73, %c640] : memref<32x768xf32, #tpu.memory_space<vmem>>, vector<32x64xf32>
    %cst_74 = arith.constant dense<0.000000e+00> : vector<16x64xf32>
    %250 = tpu.matmul %248, %249, %cst_74 {dimension_numbers = #tpu.dot_dimension_numbers<[1], [0], [0], [1], [0, 0, 1, 1], [], []>} : vector<16x32xf32>, vector<32x64xf32>, vector<16x64xf32> -> vector<16x64xf32>
    %c11 = arith.constant 11 : index
    %c0_75 = arith.constant 0 : index
    %251 = vector.load %arg4[%c11, %c0_75] : memref<16x128xf32, #tpu.memory_space<vmem>>, vector<1x64xf32>
    %252 = vector.broadcast %251 : vector<1x64xf32> to vector<16x64xf32>
    %253 = arith.addf %250, %252 : vector<16x64xf32>
    %cst_76 = arith.constant 0.000000e+00 : f32
    %254 = vector.broadcast %cst_76 : f32 to vector<16x64xf32>
    %255 = arith.maximumf %253, %254 : vector<16x64xf32>
    %c0_77 = arith.constant 0 : index
    %c0_78 = arith.constant 0 : index
    %256 = vector.load %arg5[%c0_77, %c0_78] : memref<64x32xf32, #tpu.memory_space<vmem>>, vector<64x32xf32>
    %cst_79 = arith.constant dense<0.000000e+00> : vector<16x32xf32>
    %257 = tpu.matmul %255, %256, %cst_79 {dimension_numbers = #tpu.dot_dimension_numbers<[1], [0], [0], [1], [0, 0, 1, 1], [], []>} : vector<16x64xf32>, vector<64x32xf32>, vector<16x32xf32> -> vector<16x32xf32>
    %c12 = arith.constant 12 : index
    %c0_80 = arith.constant 0 : index
    %258 = vector.load %arg4[%c12, %c0_80] : memref<16x128xf32, #tpu.memory_space<vmem>>, vector<1x32xf32>
    %259 = vector.broadcast %258 : vector<1x32xf32> to vector<16x32xf32>
    %260 = arith.addf %257, %259 : vector<16x32xf32>
    %261 = arith.addf %248, %260 : vector<16x32xf32>
    %c9 = arith.constant 9 : index
    %c0_81 = arith.constant 0 : index
    %262 = vector.load %arg4[%c9, %c0_81] : memref<16x128xf32, #tpu.memory_space<vmem>>, vector<1x32xf32>
    %c10 = arith.constant 10 : index
    %c0_82 = arith.constant 0 : index
    %263 = vector.load %arg4[%c10, %c0_82] : memref<16x128xf32, #tpu.memory_space<vmem>>, vector<1x32xf32>
    %cst_83 = arith.constant dense<0.000000e+00> : vector<16xf32>
    %264 = vector.multi_reduction <add>, %261, %cst_83 [1] : vector<16x32xf32> to vector<16xf32>
    %265 = vector.shape_cast %264 : vector<16xf32> to vector<16x1xf32>
    %cst_84 = arith.constant 3.200000e+01 : f32
    %266 = vector.broadcast %cst_84 : f32 to vector<16x1xf32>
    %267 = arith.divf %265, %266 : vector<16x1xf32>
    %268 = vector.broadcast %267 : vector<16x1xf32> to vector<16x32xf32>
    %269 = arith.subf %261, %268 : vector<16x32xf32>
    %270 = arith.mulf %269, %269 : vector<16x32xf32>
    %cst_85 = arith.constant dense<0.000000e+00> : vector<16xf32>
    %271 = vector.multi_reduction <add>, %270, %cst_85 [1] : vector<16x32xf32> to vector<16xf32>
    %272 = vector.shape_cast %271 : vector<16xf32> to vector<16x1xf32>
    %cst_86 = arith.constant 3.200000e+01 : f32
    %273 = vector.broadcast %cst_86 : f32 to vector<16x1xf32>
    %274 = arith.divf %272, %273 : vector<16x1xf32>
    %275 = vector.broadcast %267 : vector<16x1xf32> to vector<16x32xf32>
    %276 = arith.subf %261, %275 : vector<16x32xf32>
    %cst_87 = arith.constant 9.99999974E-6 : f32
    %277 = vector.broadcast %cst_87 : f32 to vector<16x1xf32>
    %278 = arith.addf %274, %277 : vector<16x1xf32>
    %279 = math.rsqrt %278 : vector<16x1xf32>
    %280 = vector.broadcast %279 : vector<16x1xf32> to vector<16x32xf32>
    %281 = arith.mulf %276, %280 : vector<16x32xf32>
    %282 = vector.broadcast %262 : vector<1x32xf32> to vector<16x32xf32>
    %283 = arith.mulf %281, %282 : vector<16x32xf32>
    %284 = vector.broadcast %263 : vector<1x32xf32> to vector<16x32xf32>
    %285 = arith.addf %283, %284 : vector<16x32xf32>
    %c0_88 = arith.constant 0 : index
    %c0_89 = arith.constant 0 : index
    %286 = vector.load %arg6[%c0_88, %c0_89] : memref<16x32xf32, #tpu.memory_space<vmem>>, vector<16x32xf32>
    tpu.vector_store %arg6[%c0_88, %c0_89], %285 {strides = array<i32>} : memref<16x32xf32, #tpu.memory_space<vmem>>, vector<16x32xf32>,
    return
  }
}

</mosaic_0001>

<bundles_post_ra>
// kernel: tpu_custom_call.1
= control target key start
LH: loop header
LB: loop body
LE: loop exit
PB: predicated region body
PF: predicated region fallthrough
CT: control target
= control target key end

     0   :  { %11 = vsyncpa [#allocation3], 0  ;;  %s2350_s0 = inlined_call_operand.vmem [shape: f32[16,32], index: 0, kind: input, shape index: {}]   ;;  %s2351_s1 = inlined_call_operand.vmem [shape: f32[16,32], index: 1, kind: input, shape index: {}]   ;;  %s2352_s2 = inlined_call_operand.vmem [shape: f32[8,8], index: 2, kind: input, shape index: {}]   ;;  %s2353_s3 = inlined_call_operand.hbm [shape: f32[32,768], index: 3, kind: input, shape index: {}]   ;;  %s2354_s4 = inlined_call_operand.vmem [shape: f32[16,128], index: 4, kind: input, shape index: {}]   ;;  %s2355_s5 = inlined_call_operand.vmem [shape: f32[64,32], index: 5, kind: input, shape index: {}]   ;;  %s2356_s6 = inlined_call_operand.hbm [shape: f32[16,32], index: 6, kind: output, shape index: {}]  }
   0x1   :  { %12 = vsyncpa [#allocation4], 0  ;;  %s23_s23 = sshll.u32 %s2353_s3, 4  ;;  %s1943_s24 = smov [#allocation2]   ;;  %s24_s23 = int_to_ptr.hbm [resolvable:$true] %s23_s23 }
   0x2   :  { %s25_s25 = sshll.u32 %s1943_s24, 4  ;;  %s1944_s26 = smov 768   ;;  %s26_s25 = int_to_ptr.vmem [resolvable:$true] %s25_s25 }
   0x3   :  { %s1945_s27 = smov 48  }
   0x4   :  { %31 = dma.hbm_to_vmem [thread:$0]  %s24_s23, 3072, %s26_s25, [#allocation3], %s1944_s26, %s1944_s26, %s1945_s27  }
   0x5   :  { %1939 = dma.done.wait [#allocation3], 3072  }
   0x6   :  { %1940 = vsyncadd [#allocation3], 4294964224  ;;  %v48_v0 = vld [vmem:[#allocation2 + $0x90] sm:$0xff]  ;;  %v47_v1 = vld [vmem:[#allocation2 + $0x60] sm:$0xff]  ;;  %vm51_vm0 = vcmask 261120   ;;  %s1946_s9 = smov 88  }
   0x7   :  { %70 = vmatpush.msra.mxu0 %v48_v0  ;;  %v46_v2 = vld [vmem:[#allocation2 + $0x30] sm:$0xff]  ;;  %v45_v3 = vld [vmem:[#allocation2] sm:$0xff]  ;;  %v2009_v5 = vld [vmem:[%s2350_s0 + $0x8] sm:$0xff]  ;;  %s1947_s10 = smov 96   ;;  %vm89_vm1 = vcmask 64512   ;;  %s1950_s13 = smov 80  }
   0x8   :  { %v2002_v4 = vld [vmem:[%s2350_s0] sm:$0xff]  ;;  %s1948_s0 = smov 120   ;;  %s1951_s14 = smov 112   ;;  %v81_v56 = vld [vmem:[#allocation2 + $0x8] sm:$0xff]  ;;  %vm1604_vm15 = vcmask 523264  }
   0x9   :  { %71 = vmatpush.msra.mxu0 %v47_v1  ;;  %v1800_v6 = vld [vmem:[%s2354_s4] ss:$0 sm:$0xff]  ;;  %s1952_s15 = smov 56   ;;  %s1953_s16 = smov 72  }
   0xa   :  { %v2045_v17 = vld [vmem:[%s2352_s2] sm:$0xff]  ;;  %s1949_s2 = smov 64   ;;  %s1954_s17 = smov 104  }
   0xb   :  { %72 = vmatpush.msra.mxu0 %v46_v2  ;;  %s1955_s18 = smov 40   ;;  %s1958_s11 = smov 128  }
   0xc   :  { %s1959_s12 = smov 8  }
   0xd   :  { %73 = vmatpush.msra.mxu0 %v45_v3 }
   0xe   :  { %1709 = vmatmul.msk.f32.vlgmr.msra.gmra.mxu0 %vm51_vm0, %v2002_v4 }
  0x16   :  { %1710 = vmatmul.msk.f32.gmra.mxu0 %vm51_vm0, %v2009_v5 }
  0x8b   :  { %v75_v7 = vpop.f32.mrf.mxu0 }
  0x8c   :  { %v2016_v8 = vadd.f32 %v1800_v6, %v75_v7 }
  0x8e   :  { %217 = vrot.lane.b32.xlu1 %v2016_v8, %s1946_s9  ;;  %87 = vrot.lane.b32.xlu0 %v2016_v8, %s1947_s10 }
  0x93   :  { %v78_v9 = vpop.f32.mrf.mxu0 }
  0x94   :  { %v2022_v10 = vadd.f32 %v1800_v6, %v78_v9 }
  0x96   :  { %245 = vrot.lane.b32.xlu2 %v2022_v10, %s1946_s9  ;;  %215 = vrot.lane.b32.xlu1 %v2016_v8, %s1948_s0 }
  0x97   :  { %115 = vrot.lane.b32.xlu0 %v2022_v10, %s1947_s10 }
  0x9e   :  { %243 = vrot.lane.b32.xlu2 %v2022_v10, %s1948_s0 }
  0xf0   :  { %v246_v15 = vpop.permute.xlu2 %245 }
  0xf8   :  { %v244_v16 = vpop.permute.xlu2 %243 }
 0x100   :  { %v218_v11 = vpop.permute.xlu1 %217  ;;  %v88_v12 = vpop.permute.xlu0 %87 }
 0x101   :  { %1711 = vmatpush.xpose.msk.msrb.mxu0 %vm89_vm1, %v88_v12  ;;  %1717 = vmatpush.xpose.msk.msra.mxu1 %vm89_vm1, %v218_v11 }
 0x104   :  { %1712 = vmatmul.msk.f32.vlgmr.msrb.gmra.mxu0 %vm89_vm1, %v2016_v8 }
 0x105   :  { %395 = vmatpush.msra.mxu0 %v81_v56 }
 0x108   :  { %v216_v13 = vpop.permute.xlu1 %215 }
 0x109   :  { %v116_v14 = vpop.permute.xlu0 %115  ;;  %1718 = vmatmul.msk.f32.vlgmr.msra.gmra.mxu1 %vm89_vm1, %v216_v13 }
 0x10a   :  { %1713 = vmatpush.xpose.msk.msra.mxu2 %vm89_vm1, %v116_v14 }
 0x10d   :  { %1714 = vmatmul.msk.f32.vlgmr.msra.gmra.mxu2 %vm89_vm1, %v2022_v10 }
 0x10e   :  { %1719 = vmatpush.xpose.msk.msrb.mxu2 %vm89_vm1, %v246_v15  ;;  %v82_v15 = vld [vmem:[#allocation2 + $0x38] sm:$0xff] }
 0x112   :  { %366 = vmatpush.msra.mxu2 %v82_v15 }
 0x115   :  { %1720 = vmatmul.msk.f32.vlgmr.msrb.gmra.mxu2 %vm89_vm1, %v244_v16 }
 0x181   :  { %v111_v18 = vpop.f32.mrf.mxu0 }
 0x182   :  { %v112_v19 = vadd.f32 %v111_v18, %v2045_v17 }
 0x184   :  { %v141_v20 = vsel %vm89_vm1, %v112_v19, -inf }
 0x185   :  { %142 = vmax.xlane.f32.xlu0 %v141_v20 }
 0x186   :  { %v240_v21 = vpop.f32.mrf.mxu1 }
 0x187   :  { %v241_v22 = vadd.f32 %v240_v21, %v2045_v17 }
 0x189   :  { %v271_v23 = vsel %vm89_vm1, %v241_v22, -inf }
 0x18a   :  { %272 = vmax.xlane.f32.xlu2 %v271_v23 }
 0x190   :  { %v138_v24 = vpop.f32.mrf.mxu2 }
 0x191   :  { %v139_v25 = vadd.f32 %v138_v24, %v2045_v17 }
 0x193   :  { %v144_v26 = vsel %vm89_vm1, %v139_v25, -inf }
 0x194   :  { %145 = vmax.xlane.f32.xlu1 %v144_v26 }
 0x198   :  { %v268_v27 = vpop.f32.mrf.mxu2 }
 0x199   :  { %v269_v28 = vadd.f32 %v268_v27, %v2045_v17 }
 0x19b   :  { %v274_v29 = vsel %vm89_vm1, %v269_v28, -inf }
 0x1ad   :  { %163 = vrot.lane.b32.xlu1 %v2016_v8, %s1949_s2 }
 0x1b5   :  { %405 = vrot.lane.b32.xlu1 %v2016_v8, %s1950_s13 }
 0x1df   :  { %275 = vmax.xlane.f32.xlu1 %v274_v29 }
 0x1f8   :  { %v143_v30 = vpop.xlane.xlu0 %142 }
 0x1f9   :  { %v147_v31 = vsub.f32 %v112_v19, %v143_v30 }
 0x1fb   :  { %v149_v32 = vmul.f32 1.442695, %v147_v31 }
 0x1fd   :  { %1813 = vpow2.f32 %v149_v32  ;;  %v273_v35 = vpop.xlane.xlu2 %272 }
 0x1fe   :  { %v277_v38 = vsub.f32 %v241_v22, %v273_v35 }
 0x200   :  { %v279_v40 = vmul.f32 1.442695, %v277_v38 }
 0x203   :  { %v1814_v33 = vpop.eup %1813 }
 0x204   :  { %v153_v34 = vsel %vm89_vm1, %v1814_v33, 0.0 }
 0x205   :  { %154 = vadd.xlane.f32.xlu2 %v153_v34 }
 0x207   :  { %v146_v36 = vpop.xlane.xlu1 %145 }
 0x208   :  { %v148_v37 = vsub.f32 %v139_v25, %v146_v36 }
 0x20a   :  { %v151_v39 = vmul.f32 1.442695, %v148_v37 }
 0x20c   :  { %1815 = vpow2.f32 %v151_v39 }
 0x20d   :  { %1817 = vpow2.f32 %v279_v40 }
 0x212   :  { %v1816_v41 = vpop.eup %1815 }
 0x213   :  { %v156_v42 = vsel %vm89_vm1, %v1816_v41, 0.0  ;;  %v1818_v43 = vpop.eup %1817 }
 0x214   :  { %157 = vadd.xlane.f32.xlu0 %v156_v42  ;;  %v283_v44 = vsel %vm89_vm1, %v1818_v43, 0.0 }
 0x21c   :  { %284 = vadd.xlane.f32.xlu0 %v283_v44 }
 0x21d   :  { %189 = vrot.lane.b32.xlu2 %v2022_v10, %s1949_s2 }
 0x21f   :  { %v164_v45 = vpop.permute.xlu1 %163 }
 0x220   :  { %184 = vmatpush.msra.mxu3 %v164_v45 }
 0x225   :  { %403 = vrot.lane.b32.xlu2 %v2016_v8, %s1951_s14 }
 0x227   :  { %v406_v46 = vpop.permute.xlu1 %405 }
 0x22d   :  { %319 = vrot.lane.b32.xlu2 %v2022_v10, %s1952_s15 }
 0x230   :  { %293 = vrot.lane.b32.xlu0 %v2016_v8, %s1952_s15 }
 0x235   :  { %433 = vrot.lane.b32.xlu2 %v2022_v10, %s1950_s13 }
 0x23d   :  { %431 = vrot.lane.b32.xlu2 %v2022_v10, %s1951_s14 }
 0x245   :  { %566 = vrot.lane.b32.xlu2 %v2016_v8, %s1953_s16 }
 0x24d   :  { %564 = vrot.lane.b32.xlu2 %v2016_v8, %s1954_s17 }
 0x252   :  { %v276_v47 = vpop.xlane.xlu1 %275 }
 0x253   :  { %v278_v48 = vsub.f32 %v269_v28, %v276_v47 }
 0x255   :  { %v281_v49 = vmul.f32 1.442695, %v278_v48  ;;  %481 = vrot.lane.b32.xlu2 %v2016_v8, %s1945_s27 }
 0x257   :  { %1819 = vpow2.f32 %v281_v49 }
 0x25d   :  { %v1820_v50 = vpop.eup %1819 }
 0x25e   :  { %v286_v51 = vsel %vm89_vm1, %v1820_v50, 0.0 }
 0x25f   :  { %287 = vadd.xlane.f32.xlu0 %v286_v51 }
 0x278   :  { %v155_v52 = vpop.xlane.xlu2 %154 }
 0x279   :  { %1821 = vrcp.f32 %v155_v52 }
 0x27f   :  { %v1822_v53 = vpop.eup %1821 }
 0x280   :  { %v190_v54 = vpop.permute.xlu2 %189  ;;  %v161_v55 = vmul.f32 %v1822_v53, %v1814_v33 }
 0x281   :  { %210 = vmatpush.msrb.mxu3 %v190_v54 }
 0x282   :  { %1715 = vmatmul.msk.f32.vlgmr.msra.gmra.mxu3 %vm89_vm1, %v161_v55 }
 0x287   :  { %v158_v57 = vpop.xlane.xlu0 %157 }
 0x288   :  { %1823 = vrcp.f32 %v158_v57  ;;  %v404_v58 = vpop.permute.xlu2 %403 }
 0x28e   :  { %v1824_v59 = vpop.eup %1823 }
 0x28f   :  { %v162_v60 = vmul.f32 %v1824_v59, %v1816_v41  ;;  %v285_v62 = vpop.xlane.xlu0 %284 }
 0x290   :  { %v320_v61 = vpop.permute.xlu2 %319  ;;  %1825 = vrcp.f32 %v285_v62 }
 0x291   :  { %1716 = vmatmul.msk.f32.vlgmr.msrb.gmra.mxu3 %vm89_vm1, %v162_v60  ;;  %340 = vmatpush.msrb.mxu1 %v320_v61 }
 0x296   :  { %v1826_v0 = vpop.eup %1825 }
 0x297   :  { %v291_v2 = vmul.f32 %v1826_v0, %v1818_v43 }
 0x298   :  { %v434_v63 = vpop.permute.xlu2 %433 }
 0x299   :  { %1729 = vmatpush.xpose.msk.msra.mxu1 %vm89_vm1, %v434_v63 }
 0x2a0   :  { %v432_v1 = vpop.permute.xlu2 %431 }
 0x2a2   :  { %v294_v3 = vpop.permute.xlu0 %293 }
 0x2a3   :  { %314 = vmatpush.msra.mxu3 %v294_v3  ;;  %v84_v3 = vld [vmem:[#allocation2 + $0x98] sm:$0xff] }
 0x2a4   :  { %1721 = vmatmul.msk.f32.vlgmr.msra.gmra.mxu3 %vm89_vm1, %v291_v2 }
 0x2a5   :  { %1727 = vmatpush.xpose.msk.msrb.mxu3 %vm89_vm1, %v406_v46 }
 0x2a8   :  { %v567_v6 = vpop.permute.xlu2 %566 }
 0x2a9   :  { %1735 = vmatpush.xpose.msk.msrb.mxu0 %vm89_vm1, %v567_v6 }
 0x2ac   :  { %1728 = vmatmul.msk.f32.vlgmr.msrb.gmra.mxu3 %vm89_vm1, %v404_v58 }
 0x2b0   :  { %v565_v7 = vpop.permute.xlu2 %564 }
 0x2b8   :  { %v482_v9 = vpop.permute.xlu2 %481 }
 0x2b9   :  { %502 = vmatpush.msra.mxu3 %v482_v9 }
 0x2d2   :  { %v288_v11 = vpop.xlane.xlu0 %287 }
 0x2d3   :  { %1827 = vrcp.f32 %v288_v11 }
 0x2d9   :  { %v1828_v12 = vpop.eup %1827 }
 0x2da   :  { %v292_v13 = vmul.f32 %v1828_v12, %v1820_v50 }
 0x2dc   :  { %1722 = vmatmul.msk.f32.vlgmr.msrb.gmra.mxu1 %vm89_vm1, %v292_v13 }
 0x2e4   :  { %1730 = vmatmul.msk.f32.vlgmr.msra.gmra.mxu1 %vm89_vm1, %v432_v1 }
 0x305   :  { %v186_v14 = vpop.f32.mrf.mxu3 }
 0x306   :  { %1725 = vmatmul.msk.f32.vlgmr.msra.gmra.mxu0 %vm89_vm1, %v186_v14 }
 0x314   :  { %v212_v16 = vpop.f32.mrf.mxu3 }
 0x315   :  { %1726 = vmatmul.msk.f32.gmra.mxu0 %vm89_vm1, %v212_v16 }
 0x31d   :  { %1736 = vmatmul.msk.f32.vlgmr.msrb.gmra.mxu0 %vm89_vm1, %v565_v7 }
 0x327   :  { %v316_v18 = vpop.f32.mrf.mxu3 }
 0x328   :  { %1723 = vmatmul.msk.f32.vlgmr.msra.gmra.mxu2 %vm89_vm1, %v316_v18 }
 0x32f   :  { %v428_v19 = vpop.f32.mrf.mxu3 }
 0x330   :  { %v429_v20 = vadd.f32 %v428_v19, %v2045_v17  ;;  %v1801_v19 = vld [vmem:[%s2354_s4 + $0x1] ss:$0 sm:$0xff] }
 0x332   :  { %v459_v21 = vsel %vm89_vm1, %v429_v20, -inf }
 0x333   :  { %460 = vmax.xlane.f32.xlu1 %v459_v21 }
 0x34c   :  { %594 = vrot.lane.b32.xlu1 %v2022_v10, %s1953_s16 }
 0x359   :  { %v342_v22 = vpop.f32.mrf.mxu1 }
 0x35a   :  { %1724 = vmatmul.msk.f32.gmra.mxu2 %vm89_vm1, %v342_v22 }
 0x361   :  { %v456_v23 = vpop.f32.mrf.mxu1 }
 0x362   :  { %v457_v24 = vadd.f32 %v456_v23, %v2045_v17 }
 0x364   :  { %v462_v25 = vsel %vm89_vm1, %v457_v24, -inf }
 0x365   :  { %463 = vmax.xlane.f32.xlu2 %v462_v25 }
 0x383   :  { %v2101_v32 = vpop.f32.mrf.mxu0 }
 0x392   :  { %v2103_v36 = vpop.f32.mrf.mxu0 }
 0x39a   :  { %v589_v39 = vpop.f32.mrf.mxu0 }
 0x39b   :  { %v590_v40 = vadd.f32 %v589_v39, %v2045_v17 }
 0x39d   :  { %v620_v41 = vsel %vm89_vm1, %v590_v40, -inf }
 0x3a6   :  { %v461_v26 = vpop.xlane.xlu1 %460 }
 0x3a7   :  { %v465_v27 = vsub.f32 %v429_v20, %v461_v26  ;;  %v1956_v26 = vmov 32.0  }
 0x3a9   :  { %v467_v28 = vmul.f32 1.442695, %v465_v27  ;;  %v827_v27 = vld [vmem:[#allocation2 + $0xa8] sm:$0xff] }
 0x3ab   :  { %1829 = vpow2.f32 %v467_v28  ;;  %v368_v13 = vpop.f32.mrf.mxu2  ;;  %v826_v28 = vld [vmem:[#allocation2 + $0x78] sm:$0xff] }
 0x3ac   :  { %v398_v16 = vadd.f32 %v2101_v32, %v368_v13 }
 0x3b1   :  { %v1830_v29 = vpop.eup %1829 }
 0x3b2   :  { %v471_v30 = vsel %vm89_vm1, %v1830_v29, 0.0 }
 0x3b3   :  { %472 = vadd.xlane.f32.xlu0 %v471_v30 }
 0x3be   :  { %v595_v31 = vpop.permute.xlu1 %594 }
 0x3bf   :  { %1737 = vmatpush.xpose.msk.msrb.mxu3 %vm89_vm1, %v595_v31  ;;  %v824_v31 = vld [vmem:[#allocation2 + $0x18] sm:$0xff] }
 0x3c7   :  { %592 = vrot.lane.b32.xlu0 %v2022_v10, %s1954_s17 }
 0x3d8   :  { %v464_v33 = vpop.xlane.xlu2 %463 }
 0x3d9   :  { %v466_v34 = vsub.f32 %v457_v24, %v464_v33 }
 0x3db   :  { %v469_v35 = vmul.f32 1.442695, %v466_v34 }
 0x3dd   :  { %1831 = vpow2.f32 %v469_v35  ;;  %v371_v14 = vpop.f32.mrf.mxu2 }
 0x3e3   :  { %v1832_v37 = vpop.eup %1831 }
 0x3e4   :  { %v474_v38 = vsel %vm89_vm1, %v1832_v37, 0.0 }
 0x3e5   :  { %475 = vadd.xlane.f32.xlu1 %v474_v38 }
 0x3f1   :  { %621 = vmax.xlane.f32.xlu0 %v620_v41 }
 0x405   :  { %642 = vrot.lane.b32.xlu0 %v2016_v8, %s1955_s18  ;;  %v83_v8 = vld [vmem:[#allocation2 + $0x68] sm:$0xff] }
 0x406   :  { %554 = vmatpush.msrb.mxu2 %v83_v8  ;;  %v792_v8 = vld [vmem:[#allocation2 + $0xa0] sm:$0xff] }
 0x408   :  { %848 = vmatpush.msra.mxu2 %v827_v27 }
 0x40a   :  { %849 = vmatpush.msra.mxu2 %v826_v28 }
 0x426   :  { %v473_v42 = vpop.xlane.xlu0 %472 }
 0x427   :  { %1833 = vrcp.f32 %v473_v42 }
 0x42d   :  { %v1834_v43 = vpop.eup %1833 }
 0x42e   :  { %v479_v44 = vmul.f32 %v1834_v43, %v1830_v29  ;;  %v825_v29 = vld [vmem:[#allocation2 + $0x48] sm:$0xff] }
 0x42f   :  { %850 = vmatpush.msra.mxu2 %v825_v29 }
 0x430   :  { %1731 = vmatmul.msk.f32.vlgmr.msra.gmra.mxu3 %vm89_vm1, %v479_v44  ;;  %v401_v44 = vadd.f32 %v2103_v36, %v371_v14  ;;  %v2145_v36 = vld [vmem:[%s2354_s4 + $0x3] ss:$0 sm:$0xff]  ;;  %v1805_v14 = vld [vmem:[%s2354_s4 + $0x2] ss:$0 sm:$0xff] }
 0x431   :  { %715 = vmatpush.msra.mxu3 %v84_v3  ;;  %851 = vmatpush.msra.mxu2 %v824_v31 }
 0x439   :  { %v593_v45 = vpop.permute.xlu0 %592 }
 0x43a   :  { %1738 = vmatmul.msk.f32.vlgmr.msrb.gmra.mxu3 %vm89_vm1, %v593_v45 }
 0x458   :  { %v476_v55 = vpop.xlane.xlu1 %475 }
 0x464   :  { %v622_v46 = vpop.xlane.xlu0 %621 }
 0x465   :  { %v626_v47 = vsub.f32 %v590_v40, %v622_v46 }
 0x467   :  { %v628_v48 = vmul.f32 1.442695, %v626_v47 }
 0x469   :  { %1835 = vpow2.f32 %v628_v48 }
 0x46a   :  { %1837 = vrcp.f32 %v476_v55 }
 0x46f   :  { %v1836_v49 = vpop.eup %1835 }
 0x470   :  { %v632_v50 = vsel %vm89_vm1, %v1836_v49, 0.0  ;;  %v1838_v57 = vpop.eup %1837 }
 0x471   :  { %633 = vadd.xlane.f32.xlu2 %v632_v50  ;;  %v480_v58 = vmul.f32 %v1838_v57, %v1832_v37 }
 0x489   :  { %507 = vrot.lane.b32.xlu2 %v2022_v10, %s1945_s27 }
 0x491   :  { %668 = vrot.lane.b32.xlu2 %v2022_v10, %s1955_s18  ;;  %v643_v10 = vpop.permute.xlu0 %642 }
 0x4b3   :  { %v504_v51 = vpop.f32.mrf.mxu3 }
 0x4b4   :  { %1733 = vmatmul.msk.f32.vlgmr.msrb.gmra.mxu2 %vm89_vm1, %v504_v51  ;;  %v791_v51 = vld [vmem:[#allocation2 + $0x70] sm:$0xff] }
 0x4bd   :  { %v617_v52 = vpop.f32.mrf.mxu3 }
 0x4be   :  { %v618_v53 = vadd.f32 %v617_v52, %v2045_v17  ;;  %v790_v52 = vld [vmem:[#allocation2 + $0x40] sm:$0xff] }
 0x4c0   :  { %v623_v54 = vsel %vm89_vm1, %v618_v53, -inf }
 0x4c1   :  { %624 = vmax.xlane.f32.xlu1 %v623_v54 }
 0x4e4   :  { %v634_v56 = vpop.xlane.xlu2 %633 }
 0x4e5   :  { %1839 = vrcp.f32 %v634_v56 }
 0x4eb   :  { %v1840_v60 = vpop.eup %1839 }
 0x4ec   :  { %v508_v59 = vpop.permute.xlu2 %507  ;;  %v640_v61 = vmul.f32 %v1840_v60, %v1836_v49 }
 0x4ed   :  { %528 = vmatpush.msrb.mxu1 %v508_v59 }
 0x4ee   :  { %1732 = vmatmul.msk.f32.vlgmr.msrb.gmra.mxu1 %vm89_vm1, %v480_v58 }
 0x4ef   :  { %663 = vmatpush.msra.mxu1 %v643_v10 }
 0x4f1   :  { %813 = vmatpush.msrb.mxu1 %v792_v8 }
 0x4f3   :  { %814 = vmatpush.msrb.mxu1 %v791_v51 }
 0x4f4   :  { %v669_v62 = vpop.permute.xlu2 %668 }
 0x4f5   :  { %689 = vmatpush.msra.mxu0 %v669_v62  ;;  %815 = vmatpush.msrb.mxu1 %v790_v52 }
 0x4f6   :  { %1739 = vmatmul.msk.f32.vlgmr.msra.gmra.mxu1 %vm89_vm1, %v640_v61 }
 0x534   :  { %v625_v17 = vpop.xlane.xlu1 %624 }
 0x535   :  { %v627_v63 = vsub.f32 %v618_v53, %v625_v17  ;;  %v789_v53 = vld [vmem:[#allocation2 + $0x10] sm:$0xff]  ;;  %v1802_v17 = vld [vmem:[%s2354_s4 + $0x5] ss:$0 sm:$0xff] }
 0x536   :  { %816 = vmatpush.msrb.mxu1 %v789_v53 }
 0x537   :  { %v630_v0 = vmul.f32 1.442695, %v627_v63  ;;  %v556_v15 = vpop.f32.mrf.mxu2 }
 0x538   :  { %v562_v18 = vadd.f32 %v556_v15, %v398_v16 }
 0x539   :  { %1841 = vpow2.f32 %v630_v0 }
 0x53f   :  { %v1842_v1 = vpop.eup %1841 }
 0x540   :  { %v635_v2 = vsel %vm89_vm1, %v1842_v1, 0.0 }
 0x541   :  { %636 = vadd.xlane.f32.xlu1 %v635_v2 }
 0x56b   :  { %v530_v6 = vpop.f32.mrf.mxu1 }
 0x56c   :  { %1734 = vmatmul.msk.f32.gmra.mxu2 %vm89_vm1, %v530_v6 }
 0x573   :  { %v665_v7 = vpop.f32.mrf.mxu1 }
 0x574   :  { %1741 = vmatmul.msk.f32.vlgmr.msra.gmra.mxu3 %vm89_vm1, %v665_v7 }
 0x5b4   :  { %v637_v9 = vpop.xlane.xlu1 %636 }
 0x5b5   :  { %1843 = vrcp.f32 %v637_v9 }
 0x5b6   :  { %1845 = vrcp.f32 %v1956_v26 }
 0x5bb   :  { %v1844_v11 = vpop.eup %1843 }
 0x5bc   :  { %v641_v12 = vmul.f32 %v1844_v11, %v1842_v1  ;;  %v1846_v30 = vpop.eup %1845  ;;  %v1803_v1 = vld [vmem:[%s2354_s4 + $0x6] ss:$0 sm:$0xff] }
 0x5bd   :  { %v739_v32 = vmul.f32 32.0, %v1846_v30  ;;  %vm743_vm2 = vweird.f32 %v1846_v30 }
 0x5be   :  { %1740 = vmatmul.msk.f32.vlgmr.msra.gmra.mxu0 %vm89_vm1, %v641_v12 }
 0x5bf   :  { %v740_v33 = vsub.f32 1.0, %v739_v32 }
 0x5c1   :  { %v741_v34 = vmul.f32 %v1846_v30, %v740_v33 }
 0x5c3   :  { %v742_v35 = vadd.f32 %v1846_v30, %v741_v34 }
 0x5c5   :  { %v2135_v37 = vsel %vm743_vm2, %v1846_v30, %v742_v35 }
 0x5ef   :  { %v559_v43 = vpop.f32.mrf.mxu2 }
 0x5f0   :  { %v563_v45 = vadd.f32 %v559_v43, %v401_v44 }
 0x5f7   :  { %v717_v20 = vpop.f32.mrf.mxu3 }
 0x5f8   :  { %v723_v21 = vadd.f32 %v717_v20, %v562_v18  ;;  %v43_v18 = vld [vmem:[%s2351_s1 + $0x8] sm:$0xff] }
 0x5fa   :  { %v726_v22 = vadd.f32 %v1801_v19, %v723_v21 }
 0x5fc   :  { %v728_v23 = vadd.f32 %v726_v22, %v2002_v4  ;;  %v42_v4 = vld [vmem:[%s2351_s1] sm:$0xff] }
 0x5fd   :  { %1745 = vmatmul.msk.f32.vlgmr.msra.gmra.mxu2 %vm51_vm0, %v42_v4 }
 0x5fe   :  { %v732_v24 = vsel %vm51_vm0, %v728_v23, 0.0 }
 0x5ff   :  { %733 = vadd.xlane.f32.xlu1 %v732_v24 }
 0x605   :  { %1746 = vmatmul.msk.f32.gmra.mxu2 %vm51_vm0, %v43_v18  ;;  %v860_v18 = vld [vmem:[#allocation2 + $0x50] sm:$0xff] }
 0x63b   :  { %v691_v25 = vpop.f32.mrf.mxu0 }
 0x63c   :  { %1742 = vmatmul.msk.f32.gmra.mxu3 %vm89_vm1, %v691_v25 }
 0x672   :  { %v734_v38 = vpop.xlane.xlu1 %733 }
 0x673   :  { %v745_v39 = vmul.f32 %v2135_v37, %v734_v38 }
 0x675   :  { %v747_v40 = vsub.f32 %v728_v23, %v745_v39 }
 0x677   :  { %v749_v41 = vmul.f32 %v747_v40, %v747_v40 }
 0x679   :  { %v751_v42 = vsel %vm51_vm0, %v749_v41, 0.0 }
 0x67a   :  { %752 = vadd.xlane.f32.xlu0 %v751_v42 }
 0x680   :  { %v853_v54 = vpop.f32.mrf.mxu2 }
 0x681   :  { %v2148_v55 = vadd.f32 %v2145_v36, %v853_v54 }
 0x683   :  { %992 = vrot.lane.b32.xlu1 %v2148_v55, %s1948_s0  ;;  %1747 = vmatpush.xpose.msk.msrb.mxu0 %vm89_vm1, %v2148_v55 }
 0x688   :  { %v856_v34 = vpop.f32.mrf.mxu2 }
 0x689   :  { %v2191_v35 = vadd.f32 %v2145_v36, %v856_v34 }
 0x68b   :  { %1749 = vmatpush.xpose.msk.msra.mxu0 %vm89_vm1, %v2191_v35 }
 0x6bf   :  { %v720_v46 = vpop.f32.mrf.mxu3 }
 0x6c0   :  { %v724_v47 = vadd.f32 %v720_v46, %v563_v45 }
 0x6c2   :  { %v727_v48 = vadd.f32 %v1801_v19, %v724_v47 }
 0x6c4   :  { %v729_v49 = vadd.f32 %v727_v48, %v2009_v5 }
 0x6c6   :  { %v735_v50 = vsel %vm51_vm0, %v729_v49, 0.0 }
 0x6c7   :  { %736 = vadd.xlane.f32.xlu2 %v735_v50 }
 0x6ed   :  { %v753_v5 = vpop.xlane.xlu0 %752 }
 0x6ee   :  { %v757_v56 = vmul.f32 %v753_v5, %v2135_v37 }
 0x6f0   :  { %v759_v57 = vadd.f32 1e-05, %v757_v56 }
 0x6f2   :  { %1847 = vrsqrt.f32 %v759_v57  ;;  %vm767_vm4 = vweird.f32 %v759_v57 }
 0x6f5   :  { %v993_v13 = vpop.permute.xlu1 %992 }
 0x6f6   :  { %1753 = vmatpush.xpose.msk.msrb.mxu2 %vm89_vm1, %v993_v13 }
 0x6f8   :  { %v1848_v58 = vpop.eup %1847 }
 0x6f9   :  { %v762_v59 = vmul.f32 %v1848_v58, %v759_v57  ;;  %vm768_vm3 = vweird.f32 %v1848_v58 }
 0x6fa   :  { %vm769_vm5 = vmor %vm767_vm4, %vm768_vm3  ;;  %1141 = vmatpush.msra.mxu2 %v860_v18 }
 0x6fb   :  { %v763_v10 = vmul.f32 %v1848_v58, %v762_v59 }
 0x6fd   :  { %v764_v60 = vmul.f32 0.5, %v763_v10 }
 0x6ff   :  { %v765_v61 = vsub.f32 1.5, %v764_v60 }
 0x701   :  { %v766_v62 = vmul.f32 %v1848_v58, %v765_v61 }
 0x703   :  { %v770_v63 = vsel %vm769_vm5, %v1848_v58, %v766_v62 }
 0x704   :  { %v781_v0 = vmul.f32 %v770_v63, %v747_v40 }
 0x706   :  { %v784_v2 = vmul.f32 %v1802_v17, %v781_v0  ;;  %v859_v0 = vld [vmem:[#allocation2 + $0x20] sm:$0xff] }
 0x708   :  { %v2161_v3 = vadd.f32 %v1803_v1, %v784_v2 }
 0x70a   :  { %1743 = vmatmul.msk.f32.vlgmr.msrb.gmra.mxu1 %vm51_vm0, %v2161_v3 }
 0x73a   :  { %v737_v6 = vpop.xlane.xlu2 %736 }
 0x73b   :  { %v746_v7 = vmul.f32 %v2135_v37, %v737_v6 }
 0x73d   :  { %v748_v9 = vsub.f32 %v729_v49, %v746_v7 }
 0x73f   :  { %v750_v11 = vmul.f32 %v748_v9, %v748_v9 }
 0x741   :  { %v754_v12 = vsel %vm51_vm0, %v750_v11, 0.0 }
 0x742   :  { %755 = vadd.xlane.f32.xlu1 %v754_v12 }
 0x787   :  { %v818_v15 = vpop.f32.mrf.mxu1 }
 0x788   :  { %v2171_v16 = vadd.f32 %v1805_v14, %v818_v15 }
 0x78a   :  { %1748 = vmatmul.msk.f32.vlgmr.msrb.gmra.mxu0 %vm89_vm1, %v2171_v16  ;;  %990 = vrot.lane.b32.xlu1 %v2171_v16, %s1948_s0 }
 0x7b5   :  { %v756_v19 = vpop.xlane.xlu1 %755 }
 0x7b6   :  { %v758_v20 = vmul.f32 %v756_v19, %v2135_v37 }
 0x7b8   :  { %v760_v21 = vadd.f32 1e-05, %v758_v20 }
 0x7ba   :  { %1849 = vrsqrt.f32 %v760_v21  ;;  %vm777_vm7 = vweird.f32 %v760_v21 }
 0x7c0   :  { %v1850_v22 = vpop.eup %1849 }
 0x7c1   :  { %v772_v23 = vmul.f32 %v1850_v22, %v760_v21  ;;  %vm778_vm6 = vweird.f32 %v1850_v22 }
 0x7c2   :  { %vm779_vm8 = vmor %vm777_vm7, %vm778_vm6 }
 0x7c3   :  { %v773_v24 = vmul.f32 %v1850_v22, %v772_v23 }
 0x7c5   :  { %v774_v25 = vmul.f32 0.5, %v773_v24 }
 0x7c7   :  { %v775_v26 = vsub.f32 1.5, %v774_v25 }
 0x7c9   :  { %v776_v27 = vmul.f32 %v1850_v22, %v775_v26 }
 0x7cb   :  { %v780_v28 = vsel %vm779_vm8, %v1850_v22, %v776_v27 }
 0x7cc   :  { %v782_v29 = vmul.f32 %v780_v28, %v748_v9 }
 0x7ce   :  { %v785_v30 = vmul.f32 %v1802_v17, %v782_v29 }
 0x7d0   :  { %v2182_v31 = vadd.f32 %v1803_v1, %v785_v30 }
 0x7d2   :  { %1744 = vmatmul.msk.f32.gmra.mxu1 %vm51_vm0, %v2182_v31 }
 0x7fc   :  { %v991_v4 = vpop.permute.xlu1 %990 }
 0x7fd   :  { %1754 = vmatmul.msk.f32.vlgmr.msrb.gmra.mxu2 %vm89_vm1, %v991_v4 }
 0x807   :  { %v887_v32 = vpop.f32.mrf.mxu0 }
 0x808   :  { %v916_v33 = vsel %vm89_vm1, %v887_v32, -inf }
 0x809   :  { %917 = vmax.xlane.f32.xlu2 %v916_v33 }
 0x821   :  { %1068 = vrot.lane.b32.xlu2 %v2148_v55, %s1946_s9 }
 0x84f   :  { %v821_v38 = vpop.f32.mrf.mxu1 }
 0x850   :  { %v2195_v39 = vadd.f32 %v1805_v14, %v821_v38 }
 0x852   :  { %1750 = vmatmul.msk.f32.vlgmr.msra.gmra.mxu0 %vm89_vm1, %v2195_v39 }
 0x87c   :  { %v918_v40 = vpop.xlane.xlu2 %917 }
 0x87d   :  { %v922_v41 = vsub.f32 %v887_v32, %v918_v40 }
 0x87f   :  { %v924_v42 = vmul.f32 1.442695, %v922_v41 }
 0x880   :  { %v1015_v43 = vpop.f32.mrf.mxu2 }
 0x881   :  { %1851 = vpow2.f32 %v924_v42  ;;  %v1046_v44 = vsel %vm89_vm1, %v1015_v43, -inf }
 0x882   :  { %1047 = vmax.xlane.f32.xlu0 %v1046_v44 }
 0x884   :  { %v1069_v56 = vpop.permute.xlu2 %1068 }
 0x887   :  { %v1852_v45 = vpop.eup %1851 }
 0x888   :  { %v928_v46 = vsel %vm89_vm1, %v1852_v45, 0.0 }
 0x889   :  { %929 = vadd.xlane.f32.xlu1 %v928_v46 }
 0x896   :  { %938 = vrot.lane.b32.xlu0 %v2148_v55, %s1947_s10 }
 0x89e   :  { %1020 = vrot.lane.b32.xlu0 %v2191_v35, %s1948_s0 }
 0x8a6   :  { %1018 = vrot.lane.b32.xlu0 %v2195_v39, %s1948_s0  ;;  %s1696_s0 = sshll.u32 %s2356_s6, 4  ;;  %s1697_s0 = int_to_ptr.hbm [resolvable:$true] %s1696_s0 }
 0x8ae   :  { %1178 = vrot.lane.b32.xlu0 %v2171_v16, %s1951_s14 }
 0x8b6   :  { %964 = vrot.lane.b32.xlu0 %v2191_v35, %s1947_s10 }
 0x8cf   :  { %v913_v47 = vpop.f32.mrf.mxu0 }
 0x8d0   :  { %v919_v48 = vsel %vm89_vm1, %v913_v47, -inf }
 0x8d1   :  { %920 = vmax.xlane.f32.xlu1 %v919_v48 }
 0x8f5   :  { %v1048_v49 = vpop.xlane.xlu0 %1047 }
 0x8f6   :  { %v1052_v50 = vsub.f32 %v1015_v43, %v1048_v49 }
 0x8f8   :  { %v1054_v8 = vmul.f32 1.442695, %v1052_v50 }
 0x8fa   :  { %1853 = vpow2.f32 %v1054_v8 }
 0x8fc   :  { %v930_v51 = vpop.xlane.xlu1 %929 }
 0x8fd   :  { %1855 = vrcp.f32 %v930_v51 }
 0x900   :  { %v1854_v52 = vpop.eup %1853 }
 0x901   :  { %v1058_v53 = vsel %vm89_vm1, %v1854_v52, 0.0 }
 0x902   :  { %1059 = vadd.xlane.f32.xlu2 %v1058_v53 }
 0x903   :  { %v1856_v36 = vpop.eup %1855 }
 0x904   :  { %v936_v54 = vmul.f32 %v1856_v36, %v1852_v45 }
 0x908   :  { %v939_v5 = vpop.permute.xlu0 %938 }
 0x909   :  { %959 = vmatpush.msrb.mxu3 %v939_v5 }
 0x90a   :  { %1751 = vmatmul.msk.f32.vlgmr.msrb.gmra.mxu3 %vm89_vm1, %v936_v54  ;;  %v861_v54 = vld [vmem:[#allocation2 + $0x80] sm:$0xff] }
 0x90b   :  { %1089 = vmatpush.msra.mxu3 %v1069_v56  ;;  %1329 = vmatpush.msrb.mxu2 %v861_v54  ;;  %v1557_v54 = vld [vmem:[#allocation2 + $0x28] sm:$0xff] }
 0x910   :  { %v1021_v57 = vpop.permute.xlu0 %1020 }
 0x911   :  { %1755 = vmatpush.xpose.msk.msrb.mxu0 %vm89_vm1, %v1021_v57 }
 0x915   :  { %1170 = vmatpush.msra.mxu0 %v859_v0 }
 0x918   :  { %v1019_v58 = vpop.permute.xlu0 %1018 }
 0x919   :  { %1756 = vmatmul.msk.f32.vlgmr.msrb.gmra.mxu0 %vm89_vm1, %v1019_v58 }
 0x91a   :  { %1180 = vrot.lane.b32.xlu2 %v2148_v55, %s1951_s14 }
 0x920   :  { %v1179_v59 = vpop.permute.xlu0 %1178 }
 0x928   :  { %v965_v10 = vpop.permute.xlu0 %964 }
 0x929   :  { %985 = vmatpush.msra.mxu1 %v965_v10 }
 0x944   :  { %v921_v60 = vpop.xlane.xlu1 %920 }
 0x945   :  { %v923_v61 = vsub.f32 %v913_v47, %v921_v60 }
 0x947   :  { %v926_v62 = vmul.f32 1.442695, %v923_v61 }
 0x949   :  { %1857 = vpow2.f32 %v926_v62 }
 0x94f   :  { %v1858_v17 = vpop.eup %1857 }
 0x950   :  { %v931_v63 = vsel %vm89_vm1, %v1858_v17, 0.0 }
 0x951   :  { %932 = vadd.xlane.f32.xlu2 %v931_v63 }
 0x969   :  { %1206 = vrot.lane.b32.xlu2 %v2195_v39, %s1951_s14 }
 0x975   :  { %v1060_v1 = vpop.xlane.xlu2 %1059 }
 0x976   :  { %1859 = vrcp.f32 %v1060_v1 }
 0x97c   :  { %v1860_v2 = vpop.eup %1859 }
 0x97d   :  { %v1066_v6 = vmul.f32 %v1860_v2, %v1854_v52  ;;  %v1181_v7 = vpop.permute.xlu2 %1180 }
 0x97e   :  { %1763 = vmatpush.xpose.msk.msrb.mxu3 %vm89_vm1, %v1181_v7 }
 0x97f   :  { %1757 = vmatmul.msk.f32.vlgmr.msra.gmra.mxu3 %vm89_vm1, %v1066_v6 }
 0x987   :  { %1764 = vmatmul.msk.f32.vlgmr.msrb.gmra.mxu3 %vm89_vm1, %v1179_v59 }
 0x98d   :  { %v961_v9 = vpop.f32.mrf.mxu3 }
 0x98e   :  { %1761 = vmatmul.msk.f32.vlgmr.msra.gmra.mxu0 %vm89_vm1, %v961_v9 }
 0x996   :  { %v1043_v11 = vpop.f32.mrf.mxu0 }
 0x997   :  { %v1049_v12 = vsel %vm89_vm1, %v1043_v11, -inf }
 0x998   :  { %1050 = vmax.xlane.f32.xlu1 %v1049_v12 }
 0x9b1   :  { %1094 = vrot.lane.b32.xlu1 %v2191_v35, %s1946_s9 }
 0x9b9   :  { %1208 = vrot.lane.b32.xlu1 %v2191_v35, %s1951_s14 }
 0x9c1   :  { %1341 = vrot.lane.b32.xlu1 %v2148_v55, %s1954_s17 }
 0x9c4   :  { %v933_v13 = vpop.xlane.xlu2 %932 }
 0x9c5   :  { %1861 = vrcp.f32 %v933_v13 }
 0x9c9   :  { %1369 = vrot.lane.b32.xlu1 %v2191_v35, %s1954_s17 }
 0x9cb   :  { %v1862_v14 = vpop.eup %1861 }
 0x9cc   :  { %v937_v15 = vmul.f32 %v1862_v14, %v1858_v17  ;;  %v1207_v44 = vpop.permute.xlu2 %1206 }
 0x9ce   :  { %1752 = vmatmul.msk.f32.vlgmr.msra.gmra.mxu1 %vm89_vm1, %v937_v15 }
 0xa02   :  { %v1091_v19 = vpop.f32.mrf.mxu3 }
 0xa03   :  { %1759 = vmatmul.msk.f32.vlgmr.msra.gmra.mxu2 %vm89_vm1, %v1091_v19 }
 0xa0a   :  { %v1203_v20 = vpop.f32.mrf.mxu3 }
 0xa0b   :  { %v1051_v21 = vpop.xlane.xlu1 %1050  ;;  %v1234_v22 = vsel %vm89_vm1, %v1203_v20, -inf  ;;  %v2253_v50 = vpop.f32.mrf.mxu0 }
 0xa0c   :  { %v1053_v23 = vsub.f32 %v1043_v11, %v1051_v21  ;;  %1235 = vmax.xlane.f32.xlu0 %v1234_v22 }
 0xa0e   :  { %v1056_v24 = vmul.f32 1.442695, %v1053_v23 }
 0xa10   :  { %1863 = vpow2.f32 %v1056_v24 }
 0xa16   :  { %v1864_v25 = vpop.eup %1863 }
 0xa17   :  { %v1061_v26 = vsel %vm89_vm1, %v1864_v25, 0.0 }
 0xa18   :  { %1062 = vadd.xlane.f32.xlu1 %v1061_v26 }
 0xa20   :  { %1256 = vrot.lane.b32.xlu0 %v2148_v55, %s1950_s13 }
 0xa23   :  { %v1095_v27 = vpop.permute.xlu1 %1094 }
 0xa24   :  { %1115 = vmatpush.msrb.mxu1 %v1095_v27 }
 0xa2b   :  { %v1209_v28 = vpop.permute.xlu1 %1208 }
 0xa2c   :  { %1765 = vmatpush.xpose.msk.msra.mxu1 %vm89_vm1, %v1209_v28 }
 0xa31   :  { %1339 = vrot.lane.b32.xlu1 %v2171_v16, %s1954_s17 }
 0xa33   :  { %v1342_v29 = vpop.permute.xlu1 %1341 }
 0xa34   :  { %1771 = vmatpush.xpose.msk.msrb.mxu0 %vm89_vm1, %v1342_v29 }
 0xa3b   :  { %v1370_v34 = vpop.permute.xlu1 %1369 }
 0xa4b   :  { %v987_v30 = vpop.f32.mrf.mxu1 }
 0xa4c   :  { %1762 = vmatmul.msk.f32.gmra.mxu0 %vm89_vm1, %v987_v30 }
 0xa7f   :  { %v1236_v4 = vpop.xlane.xlu0 %1235 }
 0xa80   :  { %v1240_v32 = vsub.f32 %v1203_v20, %v1236_v4 }
 0xa82   :  { %v1242_v33 = vmul.f32 1.442695, %v1240_v32 }
 0xa84   :  { %1865 = vpow2.f32 %v1242_v33  ;;  %v1806_v33 = vld [vmem:[%s2354_s4 + $0x4] ss:$0 sm:$0xff] }
 0xa86   :  { %v1143_v28 = vpop.f32.mrf.mxu2 }
 0xa87   :  { %v1173_v4 = vadd.f32 %v2253_v50, %v1143_v28 }
 0xa8a   :  { %v1866_v38 = vpop.eup %1865 }
 0xa8b   :  { %v1063_v40 = vpop.xlane.xlu1 %1062  ;;  %v1246_v41 = vsel %vm89_vm1, %v1866_v38, 0.0 }
 0xa8c   :  { %1867 = vrcp.f32 %v1063_v40  ;;  %1247 = vadd.xlane.f32.xlu2 %v1246_v41 }
 0xa92   :  { %v1868_v42 = vpop.eup %1867  ;;  %v1257_v43 = vpop.permute.xlu0 %1256 }
 0xa93   :  { %v1067_v16 = vmul.f32 %v1868_v42, %v1864_v25  ;;  %1277 = vmatpush.msra.mxu3 %v1257_v43 }
 0xa95   :  { %1773 = vmatpush.xpose.msk.msrb.mxu3 %vm89_vm1, %v1370_v34  ;;  %1758 = vmatmul.msk.f32.vlgmr.msrb.gmra.mxu1 %vm89_vm1, %v1067_v16 }
 0xa9d   :  { %1766 = vmatmul.msk.f32.vlgmr.msra.gmra.mxu1 %vm89_vm1, %v1207_v44 }
 0xaa3   :  { %v1340_v45 = vpop.permute.xlu1 %1339 }
 0xaa4   :  { %1367 = vrot.lane.b32.xlu2 %v2195_v39, %s1954_s17  ;;  %1772 = vmatmul.msk.f32.vlgmr.msrb.gmra.mxu0 %vm89_vm1, %v1340_v45 }
 0xac9   :  { %v2257_v51 = vpop.f32.mrf.mxu0 }
 0xaff   :  { %v1248_v46 = vpop.xlane.xlu2 %1247 }
 0xb00   :  { %1869 = vrcp.f32 %v1248_v46 }
 0xb06   :  { %v1870_v47 = vpop.eup %1869 }
 0xb07   :  { %v1254_v48 = vmul.f32 %v1870_v47, %v1866_v38  ;;  %v1368_v49 = vpop.permute.xlu2 %1367 }
 0xb09   :  { %1767 = vmatmul.msk.f32.vlgmr.msra.gmra.mxu3 %vm89_vm1, %v1254_v48 }
 0xb11   :  { %1774 = vmatmul.msk.f32.vlgmr.msrb.gmra.mxu3 %vm89_vm1, %v1368_v49 }
 0xb12   :  { %v1117_v8 = vpop.f32.mrf.mxu1 }
 0xb13   :  { %1760 = vmatmul.msk.f32.gmra.mxu2 %vm89_vm1, %v1117_v8 }
 0xb1a   :  { %v1231_v52 = vpop.f32.mrf.mxu1 }
 0xb1b   :  { %v1237_v39 = vsel %vm89_vm1, %v1231_v52, -inf }
 0xb1c   :  { %1238 = vmax.xlane.f32.xlu0 %v1237_v39 }
 0xb21   :  { %v1364_v53 = vpop.f32.mrf.mxu0 }
 0xb22   :  { %v1395_v36 = vsel %vm89_vm1, %v1364_v53, -inf }
 0xb23   :  { %1396 = vmax.xlane.f32.xlu1 %v1395_v36  ;;  %v1558_v36 = vld [vmem:[#allocation2 + $0x58] sm:$0xff] }
 0xb3c   :  { %1282 = vrot.lane.b32.xlu1 %v2191_v35, %s1950_s13 }
 0xb8c   :  { %v1279_v5 = vpop.f32.mrf.mxu3 }
 0xb8d   :  { %1769 = vmatmul.msk.f32.vlgmr.msrb.gmra.mxu2 %vm89_vm1, %v1279_v5 }
 0xb8f   :  { %v1239_v56 = vpop.xlane.xlu0 %1238 }
 0xb90   :  { %v1241_v57 = vsub.f32 %v1231_v52, %v1239_v56 }
 0xb92   :  { %v1244_v58 = vmul.f32 1.442695, %v1241_v57 }
 0xb94   :  { %1871 = vpow2.f32 %v1244_v58  ;;  %v1392_v59 = vpop.f32.mrf.mxu3 }
 0xb95   :  { %v1398_v10 = vsel %vm89_vm1, %v1392_v59, -inf }
 0xb96   :  { %v1397_v60 = vpop.xlane.xlu1 %1396  ;;  %1399 = vmax.xlane.f32.xlu2 %v1398_v10  ;;  %v1146_v29 = vpop.f32.mrf.mxu2 }
 0xb97   :  { %v1401_v61 = vsub.f32 %v1364_v53, %v1397_v60  ;;  %v1176_v16 = vadd.f32 %v2257_v51, %v1146_v29  ;;  %v1560_v53 = vld [vmem:[#allocation2 + $0xb8] sm:$0xff]  ;;  %v1559_v51 = vld [vmem:[#allocation2 + $0x88] sm:$0xff] }
 0xb99   :  { %v1403_v62 = vmul.f32 1.442695, %v1401_v61 }
 0xb9a   :  { %v1872_v17 = vpop.eup %1871 }
 0xb9b   :  { %1873 = vpow2.f32 %v1403_v62  ;;  %v1249_v63 = vsel %vm89_vm1, %v1872_v17, 0.0 }
 0xb9c   :  { %1250 = vadd.xlane.f32.xlu0 %v1249_v63 }
 0xba1   :  { %v1874_v0 = vpop.eup %1873 }
 0xba2   :  { %v1407_v1 = vsel %vm89_vm1, %v1874_v0, 0.0 }
 0xba3   :  { %1408 = vadd.xlane.f32.xlu2 %v1407_v1 }
 0xbae   :  { %v1283_v2 = vpop.permute.xlu1 %1282 }
 0xbaf   :  { %1303 = vmatpush.msrb.mxu1 %v1283_v2  ;;  %v1807_v2 = vld [vmem:[%s2354_s4 + $0x7] ss:$0 sm:$0xff] }
 0xbbb   :  { %1417 = vrot.lane.b32.xlu2 %v2148_v55, %s1953_s16  ;;  %v862_v55 = vld [vmem:[#allocation2 + $0xb0] sm:$0xff] }
 0xbbc   :  { %1490 = vmatpush.msra.mxu3 %v862_v55 }
 0xc09   :  { %v1400_v6 = vpop.xlane.xlu2 %1399 }
 0xc0a   :  { %v1402_v7 = vsub.f32 %v1392_v59, %v1400_v6 }
 0xc0c   :  { %v1405_v9 = vmul.f32 1.442695, %v1402_v7 }
 0xc0e   :  { %1875 = vpow2.f32 %v1405_v9  ;;  %v1808_v9 = vld [vmem:[%s2354_s4 + $0x8] ss:$0 sm:$0xff] }
 0xc0f   :  { %v1251_v11 = vpop.xlane.xlu0 %1250 }
 0xc10   :  { %1877 = vrcp.f32 %v1251_v11 }
 0xc14   :  { %v1876_v12 = vpop.eup %1875 }
 0xc15   :  { %v1410_v13 = vsel %vm89_vm1, %v1876_v12, 0.0 }
 0xc16   :  { %v1878_v14 = vpop.eup %1877  ;;  %1411 = vadd.xlane.f32.xlu0 %v1410_v13  ;;  %v1409_v15 = vpop.xlane.xlu2 %1408  ;;  %v1601_v13 = vld [vmem:[%s2355_s5 + $0x38] sm:$0xff] }
 0xc17   :  { %v1255_v18 = vmul.f32 %v1878_v14, %v1872_v17  ;;  %1879 = vrcp.f32 %v1409_v15  ;;  %1619 = vmatpush.msra.mxu2 %v1601_v13  ;;  %v1600_v14 = vld [vmem:[%s2355_s5 + $0x30] sm:$0xff]  ;;  %v1599_v15 = vld [vmem:[%s2355_s5 + $0x28] sm:$0xff] }
 0xc19   :  { %1768 = vmatmul.msk.f32.vlgmr.msrb.gmra.mxu1 %vm89_vm1, %v1255_v18  ;;  %1620 = vmatpush.msra.mxu2 %v1600_v14  ;;  %v1598_v18 = vld [vmem:[%s2355_s5 + $0x20] sm:$0xff] }
 0xc1b   :  { %1621 = vmatpush.msra.mxu2 %v1599_v15 }
 0xc1d   :  { %v1880_v19 = vpop.eup %1879  ;;  %1622 = vmatpush.msra.mxu2 %v1598_v18 }
 0xc1e   :  { %v1415_v20 = vmul.f32 %v1880_v19, %v1874_v0  ;;  %v1418_v21 = vpop.permute.xlu2 %1417  ;;  %v1597_v19 = vld [vmem:[%s2355_s5 + $0x18] sm:$0xff] }
 0xc1f   :  { %1438 = vmatpush.msra.mxu1 %v1418_v21  ;;  %1623 = vmatpush.msra.mxu2 %v1597_v19  ;;  %v1595_v21 = vld [vmem:[%s2355_s5 + $0x8] sm:$0xff] }
 0xc21   :  { %1775 = vmatmul.msk.f32.vlgmr.msra.gmra.mxu1 %vm89_vm1, %v1415_v20  ;;  %v1596_v20 = vld [vmem:[%s2355_s5 + $0x10] sm:$0xff] }
 0xc22   :  { %1581 = vmatpush.msrb.mxu1 %v1560_v53  ;;  %1624 = vmatpush.msra.mxu2 %v1596_v20 }
 0xc24   :  { %1582 = vmatpush.msrb.mxu1 %v1559_v51  ;;  %1625 = vmatpush.msra.mxu2 %v1595_v21 }
 0xc26   :  { %1583 = vmatpush.msrb.mxu1 %v1558_v36 }
 0xc28   :  { %1584 = vmatpush.msrb.mxu1 %v1557_v54 }
 0xc2a   :  { %1443 = vrot.lane.b32.xlu0 %v2191_v35, %s1953_s16  ;;  %v1331_v35 = vpop.f32.mrf.mxu2 }
 0xc2b   :  { %v1337_v32 = vadd.f32 %v1331_v35, %v1173_v4 }
 0xc89   :  { %v1412_v22 = vpop.xlane.xlu0 %1411 }
 0xc8a   :  { %1881 = vrcp.f32 %v1412_v22  ;;  %v1594_v22 = vld [vmem:[%s2355_s5] sm:$0xff] }
 0xc8b   :  { %1626 = vmatpush.msra.mxu2 %v1594_v22 }
 0xc90   :  { %v1882_v24 = vpop.eup %1881 }
 0xc91   :  { %v1416_v25 = vmul.f32 %v1882_v24, %v1876_v12 }
 0xc96   :  { %v1305_v23 = vpop.f32.mrf.mxu1 }
 0xc97   :  { %1770 = vmatmul.msk.f32.gmra.mxu2 %vm89_vm1, %v1305_v23 }
 0xc9c   :  { %v1444_v26 = vpop.permute.xlu0 %1443 }
 0xc9d   :  { %1464 = vmatpush.msra.mxu0 %v1444_v26 }
 0xc9e   :  { %v1440_v27 = vpop.f32.mrf.mxu1  ;;  %1776 = vmatmul.msk.f32.vlgmr.msra.gmra.mxu0 %vm89_vm1, %v1416_v25 }
 0xc9f   :  { %1777 = vmatmul.msk.f32.vlgmr.msra.gmra.mxu3 %vm89_vm1, %v1440_v27 }
 0xd1a   :  { %v1334_v43 = vpop.f32.mrf.mxu2 }
 0xd1b   :  { %v1466_v30 = vpop.f32.mrf.mxu0  ;;  %v1338_v45 = vadd.f32 %v1334_v43, %v1176_v16 }
 0xd1c   :  { %1778 = vmatmul.msk.f32.gmra.mxu3 %vm89_vm1, %v1466_v30 }
 0xd22   :  { %v1492_v34 = vpop.f32.mrf.mxu3 }
 0xd23   :  { %v1498_v38 = vadd.f32 %v1492_v34, %v1337_v32 }
 0xd25   :  { %v1501_v40 = vadd.f32 %v1806_v33, %v1498_v38 }
 0xd27   :  { %v1503_v41 = vadd.f32 %v1501_v40, %v2161_v3 }
 0xd29   :  { %v1507_v42 = vsel %vm51_vm0, %v1503_v41, 0.0 }
 0xd2a   :  { %1508 = vadd.xlane.f32.xlu1 %v1507_v42 }
 0xd9d   :  { %v1509_v44 = vpop.xlane.xlu1 %1508 }
 0xd9e   :  { %v1513_v46 = vmul.f32 %v1509_v44, %v2135_v37  ;;  %v1810_v44 = vld [vmem:[%s2354_s4 + $0xc] ss:$0 sm:$0xff] }
 0xd9f   :  { %v1495_v47 = vpop.f32.mrf.mxu3 }
 0xda0   :  { %v1515_v48 = vsub.f32 %v1503_v41, %v1513_v46  ;;  %v1499_v49 = vadd.f32 %v1495_v47, %v1338_v45 }
 0xda2   :  { %v1502_v50 = vadd.f32 %v1806_v33, %v1499_v49  ;;  %v1517_v8 = vmul.f32 %v1515_v48, %v1515_v48  ;;  %v1809_v33 = vld [vmem:[%s2354_s4 + $0xb] ss:$0 sm:$0xff] }
 0xda4   :  { %v1519_v52 = vsel %vm51_vm0, %v1517_v8, 0.0  ;;  %v1504_v39 = vadd.f32 %v1502_v50, %v2182_v31 }
 0xda5   :  { %1520 = vadd.xlane.f32.xlu2 %v1519_v52 }
 0xda6   :  { %v1510_v3 = vsel %vm51_vm0, %v1504_v39, 0.0 }
 0xda7   :  { %1511 = vadd.xlane.f32.xlu0 %v1510_v3 }
 0xe18   :  { %v1521_v5 = vpop.xlane.xlu2 %1520 }
 0xe19   :  { %v1525_v56 = vmul.f32 %v1521_v5, %v2135_v37 }
 0xe1a   :  { %v1512_v57 = vpop.xlane.xlu0 %1511 }
 0xe1b   :  { %v1527_v58 = vadd.f32 1e-05, %v1525_v56  ;;  %v1514_v59 = vmul.f32 %v1512_v57, %v2135_v37 }
 0xe1d   :  { %1883 = vrsqrt.f32 %v1527_v58  ;;  %v1516_v31 = vsub.f32 %v1504_v39, %v1514_v59  ;;  %vm1535_vm10 = vweird.f32 %v1527_v58 }
 0xe1f   :  { %v1518_v10 = vmul.f32 %v1516_v31, %v1516_v31 }
 0xe21   :  { %v1522_v60 = vsel %vm51_vm0, %v1518_v10, 0.0 }
 0xe22   :  { %1523 = vadd.xlane.f32.xlu1 %v1522_v60 }
 0xe23   :  { %v1884_v61 = vpop.eup %1883 }
 0xe24   :  { %v1530_v62 = vmul.f32 %v1884_v61, %v1527_v58  ;;  %vm1536_vm9 = vweird.f32 %v1884_v61 }
 0xe25   :  { %vm1537_vm11 = vmor %vm1535_vm10, %vm1536_vm9 }
 0xe26   :  { %v1531_v17 = vmul.f32 %v1884_v61, %v1530_v62 }
 0xe28   :  { %v1532_v63 = vmul.f32 0.5, %v1531_v17 }
 0xe2a   :  { %v1533_v0 = vsub.f32 1.5, %v1532_v63 }
 0xe2c   :  { %v1534_v1 = vmul.f32 %v1884_v61, %v1533_v0 }
 0xe2e   :  { %v1538_v6 = vsel %vm1537_vm11, %v1884_v61, %v1534_v1  ;;  %v1811_v1 = vld [vmem:[%s2354_s4 + $0x9] ss:$0 sm:$0xff] }
 0xe2f   :  { %v1549_v7 = vmul.f32 %v1538_v6, %v1515_v48  ;;  %v1812_v6 = vld [vmem:[%s2354_s4 + $0xa] ss:$0 sm:$0xff]  ;;  %s1957_s4 = smov [#allocation5]  }
 0xe30   :  { %s1694_s8 = sshll.u32 %s1957_s4, 4  ;;  %s1695_s8 = int_to_ptr.vmem [resolvable:$true] %s1694_s8 }
 0xe31   :  { %v1552_v11 = vmul.f32 %v1807_v2, %v1549_v7 }
 0xe33   :  { %v1555_v12 = vadd.f32 %v1808_v9, %v1552_v11 }
 0xe35   :  { %1779 = vmatmul.msk.f32.vlgmr.msrb.gmra.mxu1 %vm51_vm0, %v1555_v12 }
 0xe95   :  { %v1524_v55 = vpop.xlane.xlu1 %1523 }
 0xe96   :  { %v1526_v23 = vmul.f32 %v1524_v55, %v2135_v37 }
 0xe98   :  { %v1528_v24 = vadd.f32 1e-05, %v1526_v23 }
 0xe9a   :  { %1885 = vrsqrt.f32 %v1528_v24  ;;  %vm1545_vm13 = vweird.f32 %v1528_v24 }
 0xea0   :  { %v1886_v25 = vpop.eup %1885 }
 0xea1   :  { %v1540_v26 = vmul.f32 %v1886_v25, %v1528_v24  ;;  %vm1546_vm12 = vweird.f32 %v1886_v25 }
 0xea2   :  { %vm1547_vm14 = vmor %vm1545_vm13, %vm1546_vm12 }
 0xea3   :  { %v1541_v27 = vmul.f32 %v1886_v25, %v1540_v26 }
 0xea5   :  { %v1542_v28 = vmul.f32 0.5, %v1541_v27 }
 0xea7   :  { %v1543_v29 = vsub.f32 1.5, %v1542_v28 }
 0xea9   :  { %v1544_v30 = vmul.f32 %v1886_v25, %v1543_v29 }
 0xeab   :  { %v1548_v35 = vsel %vm1547_vm14, %v1886_v25, %v1544_v30 }
 0xeac   :  { %v1550_v4 = vmul.f32 %v1548_v35, %v1516_v31 }
 0xeae   :  { %v1553_v32 = vmul.f32 %v1807_v2, %v1550_v4 }
 0xeb0   :  { %v1556_v34 = vadd.f32 %v1808_v9, %v1553_v32 }
 0xeb2   :  { %v1586_v38 = vpop.f32.mrf.mxu1  ;;  %1780 = vmatmul.msk.f32.gmra.mxu1 %vm51_vm0, %v1556_v34 }
 0xeb3   :  { %v1587_v40 = vadd.f32 %v1809_v33, %v1586_v38 }
 0xeb5   :  { %v1592_v41 = vmax.f32 %v1587_v40, 0.0 }
 0xeb7   :  { %1781 = vmatmul.msk.f32.vlgmr.msra.gmra.mxu2 %vm1604_vm15, %v1592_v41 }
 0xf2f   :  { %v1589_v42 = vpop.f32.mrf.mxu1 }
 0xf30   :  { %v1590_v43 = vadd.f32 %v1809_v33, %v1589_v42 }
 0xf32   :  { %v1593_v16 = vmax.f32 %v1590_v43, 0.0 }
 0xf34   :  { %1782 = vmatmul.msk.f32.gmra.mxu2 %vm1604_vm15, %v1593_v16 }
 0xf3a   :  { %v1628_v45 = vpop.f32.mrf.mxu2 }
 0xf3b   :  { %v1629_v46 = vadd.f32 %v1810_v44, %v1628_v45 }
 0xf3d   :  { %v1634_v47 = vadd.f32 %v1629_v46, %v1555_v12 }
 0xf3f   :  { %v1638_v48 = vsel %vm51_vm0, %v1634_v47, 0.0 }
 0xf40   :  { %1639 = vadd.xlane.f32.xlu0 %v1638_v48 }
 0xfb3   :  { %v1640_v49 = vpop.xlane.xlu0 %1639 }
 0xfb4   :  { %v1644_v50 = vmul.f32 %v1640_v49, %v2135_v37 }
 0xfb6   :  { %v1646_v8 = vsub.f32 %v1634_v47, %v1644_v50 }
 0xfb7   :  { %v1631_v52 = vpop.f32.mrf.mxu2 }
 0xfb8   :  { %v1632_v39 = vadd.f32 %v1810_v44, %v1631_v52  ;;  %v1648_v3 = vmul.f32 %v1646_v8, %v1646_v8 }
 0xfba   :  { %v1650_v53 = vsel %vm51_vm0, %v1648_v3, 0.0  ;;  %v1635_v51 = vadd.f32 %v1632_v39, %v1556_v34 }
 0xfbb   :  { %1651 = vadd.xlane.f32.xlu1 %v1650_v53 }
 0xfbc   :  { %v1641_v36 = vsel %vm51_vm0, %v1635_v51, 0.0 }
 0xfbd   :  { %1642 = vadd.xlane.f32.xlu2 %v1641_v36 }
0x102e   :  { %v1652_v54 = vpop.xlane.xlu1 %1651 }
0x102f   :  { %v1656_v5 = vmul.f32 %v1652_v54, %v2135_v37 }
0x1030   :  { %v1643_v56 = vpop.xlane.xlu2 %1642 }
0x1031   :  { %v1658_v57 = vadd.f32 1e-05, %v1656_v5  ;;  %v1645_v58 = vmul.f32 %v1643_v56, %v2135_v37 }
0x1033   :  { %1887 = vrsqrt.f32 %v1658_v57  ;;  %v1647_v59 = vsub.f32 %v1635_v51, %v1645_v58  ;;  %vm1666_vm2 = vweird.f32 %v1658_v57 }
0x1035   :  { %v1649_v31 = vmul.f32 %v1647_v59, %v1647_v59 }
0x1037   :  { %v1653_v10 = vsel %vm51_vm0, %v1649_v31, 0.0 }
0x1038   :  { %1654 = vadd.xlane.f32.xlu0 %v1653_v10 }
0x1039   :  { %v1888_v60 = vpop.eup %1887 }
0x103a   :  { %v1661_v61 = vmul.f32 %v1888_v60, %v1658_v57  ;;  %vm1667_vm1 = vweird.f32 %v1888_v60 }
0x103b   :  { %vm1668_vm3 = vmor %vm1666_vm2, %vm1667_vm1 }
0x103c   :  { %v1662_v62 = vmul.f32 %v1888_v60, %v1661_v61 }
0x103e   :  { %v1663_v17 = vmul.f32 0.5, %v1662_v62 }
0x1040   :  { %v1664_v63 = vsub.f32 1.5, %v1663_v17 }
0x1042   :  { %v1665_v0 = vmul.f32 %v1888_v60, %v1664_v63 }
0x1044   :  { %v1669_v2 = vsel %vm1668_vm3, %v1888_v60, %v1665_v0 }
0x1045   :  { %v1680_v7 = vmul.f32 %v1669_v2, %v1646_v8 }
0x1047   :  { %v1683_v9 = vmul.f32 %v1811_v1, %v1680_v7 }
0x1049   :  { %v1686_v11 = vadd.f32 %v1812_v6, %v1683_v9 }
0x104b   :  { %1688 = vst.msk [vmem:[#allocation5] sm:$0xff] %vm51_vm0, %v1686_v11 }
0x10ab   :  { %v1655_v12 = vpop.xlane.xlu0 %1654 }
0x10ac   :  { %v1657_v13 = vmul.f32 %v1655_v12, %v2135_v37 }
0x10ae   :  { %v1659_v14 = vadd.f32 1e-05, %v1657_v13 }
0x10b0   :  { %1889 = vrsqrt.f32 %v1659_v14  ;;  %vm1676_vm5 = vweird.f32 %v1659_v14 }
0x10b6   :  { %v1890_v15 = vpop.eup %1889 }
0x10b7   :  { %v1671_v18 = vmul.f32 %v1890_v15, %v1659_v14  ;;  %vm1677_vm4 = vweird.f32 %v1890_v15 }
0x10b8   :  { %vm1678_vm6 = vmor %vm1676_vm5, %vm1677_vm4 }
0x10b9   :  { %v1672_v19 = vmul.f32 %v1890_v15, %v1671_v18 }
0x10bb   :  { %v1673_v20 = vmul.f32 0.5, %v1672_v19 }
0x10bd   :  { %v1674_v21 = vsub.f32 1.5, %v1673_v20 }
0x10bf   :  { %v1675_v55 = vmul.f32 %v1890_v15, %v1674_v21 }
0x10c1   :  { %v1679_v22 = vsel %vm1678_vm6, %v1890_v15, %v1675_v55 }
0x10c2   :  { %v1681_v23 = vmul.f32 %v1679_v22, %v1647_v59 }
0x10c4   :  { %v1684_v37 = vmul.f32 %v1811_v1, %v1681_v23 }
0x10c6   :  { %v1687_v24 = vadd.f32 %v1812_v6, %v1684_v37 }
0x10c8   :  { %1689 = vst.msk [vmem:[#allocation5 + $0x8] sm:$0xff] %vm51_vm0, %v1687_v24 }
0x10c9   :  { %1702 = dma.vmem_to_hbm [thread:$0]  %s1695_s8, 256, %s1697_s0, [#allocation4], %s1958_s11, %s1958_s11, %s1959_s12  }
0x10ca   :  { %1941 = dma.done.wait [#allocation4], 256  }
0x10cb   :  { %1942 = vsyncadd [#allocation4], 4294967040 }
0x10cc   :  { %1707 = vsyncpa [#allocation3], 1 }
0x10cd   :  { %1708 = vsyncpa [#allocation4], 1 }

</bundles_post_ra>
